<compile_context>
chip_gen: v7x
topology: tpu7x:2x2x1
jax: 0.10.0
libtpu: 0.0.40
codegen_flags: <defaults>
</compile_context>

<pallas_src>
import math
from functools import lru_cache

import numpy as np

import jax
import jax.numpy as jnp
from jax.experimental import pallas as pl
from jax.experimental.pallas import tpu as pltpu

# ---------------- small-shape analog of the real pSp opts ----------------
OUTPUT_SIZE = 32                                      # real model: 1024
N_STYLES = int(math.log(OUTPUT_SIZE, 2)) * 2 - 2      # = 8 (same formula as pSp.__init__)
LATENT = 64                                           # real model: 512
N_DOMAINS = 2                                         # opts.n_domains
IMG_C = 3                                             # decoder RGB output
LABEL_NC = 1                                          # Interpreter mask channels (opts.label_nc)
POOL_OUT = OUTPUT_SIZE // 2                           # analog of AdaptiveAvgPool2d((256, 256))


# --------------------------- chip-dependent config ---------------------------
@lru_cache(maxsize=1)
def _chip_cfg():
    kind = ""
    try:
        kind = jax.devices()[0].device_kind.lower()
    except Exception:
        pass
    is_v7x = ("7x" in kind) or ("v7" in kind) or ("tpu7" in kind)
    # chips with >1 TensorCore per chip (megacore-style grid sharding)
    multi_tc = is_v7x or any(s in kind for s in ("v2", "v3", "v4", "v5p"))
    if is_v7x:
        # 64 MiB physical VMEM per TC: weight blocks <= 8 MiB (16 MiB double-
        # buffered), explicit 48 MiB scoped limit, split N across both cores.
        return dict(tk_cap=1024, tn_cap=2048, w_block_cap=8 << 20,
                    vmem_limit=48 << 20, min_n_blocks=2)
    # v5e / v6e (and default): 128 MiB physical VMEM, single TensorCore ->
    # biggest lane-dense tiles, no forced N split.  Explicit 64 MiB limit so
    # big weight blocks don't trip the 16 MiB (v5e) / 32 MiB scoped defaults.
    return dict(tk_cap=2048, tn_cap=4096, w_block_cap=16 << 20,
                vmem_limit=64 << 20, min_n_blocks=2 if multi_tc else 1)


# ============================ fused matmul kernel =============================
def _matmul_bias_kernel(x_ref, w_ref, add_ref, o_ref, acc_ref):
    """o = x @ w + add, accumulated in f32 over the K grid axis (last).

    x_ref  : (Mp, tk) bf16      activations (cast once in the wrapper)
    w_ref  : (tk, tn) bf16      weights (half-width DMA stream)
    add_ref: (1|Mp, tn) f32     bias / fused per-row addend (k-invariant block)
    """
    k = pl.program_id(1)

    @pl.when(k == 0)
    def _():
        acc_ref[...] = jnp.zeros_like(acc_ref)

    acc_ref[...] += jnp.dot(x_ref[...], w_ref[...],
                            preferred_element_type=jnp.float32)

    @pl.when(k == pl.num_programs(1) - 1)
    def _():
        o_ref[...] = (acc_ref[...] + add_ref[...]).astype(o_ref.dtype)


def _pick_tile(dim, cap, min_blocks=1):
    """Pick (tile, padded_dim): tile is a multiple of 128 (or the full dim),
    padded_dim % tile == 0 and padded_dim >= dim.

    Preference order: exact divisor of dim (no zero padding), block count
    >= min_blocks (and even, for a balanced megacore split), largest tile.
    Never returns an unbounded full-dim block when dim > cap."""
    cap = max(128, (cap // 128) * 128)
    if dim <= 128:
        return dim, dim
    cands = list(range(128, cap + 1, 128))
    if dim <= cap:
        cands.append(dim)            # full-extent block is always legal

    def nblocks(t):
        return -(-dim // t)

    def score(t):
        nb = nblocks(t)
        return (nb * t == dim,                                    # no padding
                nb >= min_blocks,                                 # enough blocks
                (min_blocks <= 1) or (nb % 2 == 0) or nb == 1,    # balanced split
                t)                                                # biggest DMA

    t = max(cands, key=score)
    return t, nblocks(t) * t


def _pad2(a, rows, cols):
    pr, pc = rows - a.shape[0], cols - a.shape[1]
    if pr == 0 and pc == 0:
        return a
    return jnp.pad(a, ((0, pr), (0, pc)))


def matmul_bias_add(x, w, addend):
    """x: (M, K), w: (K, N) (streamed bf16), addend: (1, N) or (M, N) f32.

    Returns x @ w + addend with f32 accumulation.  M is padded to a multiple
    of 16 (clean bf16 sublane packing); K / N are zero-padded up to the tile
    when they have no 128-multiple divisor under the cap.  Padding is sliced
    off before returning."""
    M, K = x.shape
    Kw, N = w.shape
    assert K == Kw
    cfg = _chip_cfg()

    tn, Np = _pick_tile(N, cfg["tn_cap"], min_blocks=cfg["min_n_blocks"])
    # bound the streamed weight block (bf16) so double-buffering fits VMEM
    tk_cap = max(128, min(cfg["tk_cap"], cfg["w_block_cap"] // (2 * tn)))
    tk, Kp = _pick_tile(K, tk_cap, min_blocks=1)

    Mp = max(16, -(-M // 16) * 16)
    xp = _pad2(x.astype(jnp.bfloat16), Mp, Kp)        # cast once, not per step
    wp = _pad2(w.astype(jnp.bfloat16), Kp, Np)

    add_rows = addend.shape[0]
    assert add_rows in (1, M), "addend must be (1, N) or (M, N)"
    ar = Mp if add_rows == M else 1                   # only per-row addends get Mp rows
    addp = _pad2(addend.astype(jnp.float32), ar, Np)

    grid = (Np // tn, Kp // tk)                       # reduction (K) axis last
    out = pl.pallas_call(
        _matmul_bias_kernel,
        out_shape=jax.ShapeDtypeStruct((Mp, Np), jnp.float32),
        grid_spec=pltpu.PrefetchScalarGridSpec(
            num_scalar_prefetch=0,
            grid=grid,
            in_specs=[
                pl.BlockSpec((Mp, tk), lambda n, k: (0, k)),
                pl.BlockSpec((tk, tn), lambda n, k: (k, n)),
                pl.BlockSpec((ar, tn), lambda n, k: (0, n)),   # k-invariant
            ],
            out_specs=pl.BlockSpec((Mp, tn), lambda n, k: (0, n)),
            scratch_shapes=[pltpu.VMEM((Mp, tn), jnp.float32)],
        ),
        compiler_params=pltpu.CompilerParams(
            dimension_semantics=("parallel", "arbitrary"),
            vmem_limit_bytes=cfg["vmem_limit"]),
    )(xp, wp, addp)
    return out[:M, :N]


# ===================== adaptive average pool (VPU + tiny matmul) =============
@lru_cache(maxsize=None)
def _col_pool_weight(w, out_w, fh):
    """(W, Wo) f32 separable column-pool matrix; entries 1/(fh*fw) inside each
    pooling window.  Combined with the in-kernel sum over the fh row strip it
    gives the exact adaptive average pool (out size divides input size)."""
    fw = w // out_w
    pw = np.repeat(np.eye(out_w, dtype=np.float32), fw, axis=0) / float(fh * fw)
    return jnp.asarray(pw)                                           # (W, Wo)


def _make_pool_kernel(fh):
    def kernel(x_ref, pw_ref, o_ref):
        # x_ref : (tr, fh, W) f32, rows are (B*C*Ho) pooled-H strips
        # pw_ref: (W, Wo) f32
        acc = x_ref[:, 0, :]
        for j in range(1, fh):                       # static unrolled fh adds (VPU)
            acc = acc + x_ref[:, j, :]
        o_ref[...] = jnp.dot(acc, pw_ref[...],       # fw pooling (tiny MXU op)
                             preferred_element_type=jnp.float32)
    return kernel


def _row_tile(rows, cap=1024):
    for t in range(min(rows, cap), 7, -8):
        if rows % t == 0:
            return t
    return rows


def face_pool(images, out_size):
    """images: (B, C, H, W) f32 -> (B, C, out_size, out_size).

    One pass: reshape (free, contiguous) to (B*C*Ho, fh, W) strips, sum the fh
    rows on the VPU and pool the W axis with a tiny (W, Wo) f32 matmul.  No
    Kronecker matrix, no zero-add stream; scales to the real 1024->256 pool."""
    B, C, H, W = images.shape
    assert H % out_size == 0 and W % out_size == 0
    fh = H // out_size
    R = B * C * out_size
    Rp = -(-R // 8) * 8
    x_r = images.astype(jnp.float32).reshape(R, fh, W)
    if Rp != R:
        x_r = jnp.pad(x_r, ((0, Rp - R), (0, 0), (0, 0)))
    pw = _col_pool_weight(W, out_size, fh)
    tr = _row_tile(Rp)

    out = pl.pallas_call(
        _make_pool_kernel(fh),
        out_shape=jax.ShapeDtypeStruct((Rp, out_size), jnp.float32),
        grid_spec=pltpu.PrefetchScalarGridSpec(
            num_scalar_prefetch=0,
            grid=(Rp // tr,),
            in_specs=[pl.BlockSpec((tr, fh, W), lambda r: (r, 0, 0)),
                      pl.BlockSpec((W, out_size), lambda r: (0, 0))],
            out_specs=pl.BlockSpec((tr, out_size), lambda r: (r, 0)),
        ),
        compiler_params=pltpu.CompilerParams(
            dimension_semantics=("parallel",),
            vmem_limit_bytes=_chip_cfg()["vmem_limit"]),
    )(x_r, pw)
    return out[:R].reshape(B, C, out_size, out_size)


# ================================ pSp forward ================================
def psp_forward(x, label, params, resize=True):
    """x: (B, IMG_C, H, W) NCHW, label: (B, N_DOMAINS) one-hot."""
    B = x.shape[0]

    # --- encoder + start_from_latent_avg (learn_in_w=False), fused epilogue ---
    # TODO(synk): label-conditioned DSBN and residual feature maps of
    #             fs_encoder_v2 are not modeled (disable_residuals=True path).
    dom = jnp.argmax(label, axis=-1)                                  # (B,)
    avg = params["latent_avg"][dom]                                   # (B, L)
    # flat index s*LATENT + l of codes gets avg[b, l] added for every style s,
    # i.e. `codes + latent_avg[argmax(label)][:, None]`
    enc_add = jnp.tile(avg, (1, N_STYLES)) + params["enc_b"]          # (B, S*L) per-row
    x_flat = x.reshape(B, -1)                                         # (B, C*H*W)
    codes_flat = matmul_bias_add(x_flat, params["enc_w"], enc_add)    # (B, S*L)

    # --- interpreter(codes, label, decoder, ...) -> cat([image, mask], dim=1) ---
    # TODO(synk): StyleGAN2 modulated-conv synthesis and Interpreter mask head
    #             are replaced by one linear synthesis map; the channel-dim
    #             concatenation of (image, mask) is preserved.
    out_flat = matmul_bias_add(codes_flat, params["dec_w"], params["dec_b"])
    images = out_flat.reshape(B, IMG_C + LABEL_NC, OUTPUT_SIZE, OUTPUT_SIZE)

    # --- self.face_pool (AdaptiveAvgPool2d) ---
    if resize:
        images = face_pool(images, POOL_OUT)
    return images


# ============================ deterministic params ===========================
def init_params(key):
    k1, k2, k3 = jax.random.split(key, 3)
    d_in = IMG_C * OUTPUT_SIZE * OUTPUT_SIZE
    d_code = N_STYLES * LATENT
    d_out = (IMG_C + LABEL_NC) * OUTPUT_SIZE * OUTPUT_SIZE
    return dict(
        # weights stored in bf16 (streamed half-width to the MXU; f32 accumulate)
        enc_w=(jax.random.normal(k1, (d_in, d_code), jnp.float32)
               * (1.0 / math.sqrt(d_in))).astype(jnp.bfloat16),
        enc_b=jnp.zeros((1, d_code), jnp.float32),
        dec_w=(jax.random.normal(k2, (d_code, d_out), jnp.float32)
               * (1.0 / math.sqrt(d_code))).astype(jnp.bfloat16),
        dec_b=jnp.zeros((1, d_out), jnp.float32),
        latent_avg=jax.random.normal(k3, (N_DOMAINS, LATENT), jnp.float32) * 0.01,
    )


if __name__ == "__main__":
    key = jax.random.PRNGKey(0)
    kx, kp = jax.random.split(key)
    B = 2
    x = jax.random.normal(kx, (B, IMG_C, OUTPUT_SIZE, OUTPUT_SIZE), jnp.float32)
    label = jnp.eye(N_DOMAINS, dtype=jnp.float32)[jnp.array([0, 1])]   # one-hot domains
    params = init_params(kp)

    images = psp_forward(x, label, params, resize=True)
    images = jax.block_until_ready(images)
    assert images.shape == (B, IMG_C + LABEL_NC, POOL_OUT, POOL_OUT)
    assert bool(jnp.all(jnp.isfinite(images)))
    print("KERNEL_OK")
</pallas_src>

<mosaic_0001>
module attributes {stable_mosaic.version = 11 : i64} {
  func.func @_matmul_bias_kernel(%arg0: i32, %arg1: i32, %arg2: memref<16x1536xbf16, #tpu.memory_space<vmem>>, %arg3: memref<1536x512xbf16, #tpu.memory_space<vmem>>, %arg4: memref<16x512xf32, #tpu.memory_space<vmem>>, %arg5: memref<16x512xf32, #tpu.memory_space<vmem>>, %arg6: memref<16x512xf32, #tpu.memory_space<vmem>>) attributes {dimension_semantics = [#tpu.dimension_semantics<parallel>, #tpu.dimension_semantics<arbitrary>], iteration_bounds = array<i64: 1, 2>, scalar_prefetch = 0 : i64, scratch_operands = 1 : i64, tpu.core_type = #tpu.core_type<tc>, window_params = [{transform_indices = @transform_0, window_bounds = array<i64: 16, 1536>}, {transform_indices = @transform_1, window_bounds = array<i64: 1536, 512>}, {transform_indices = @transform_2, window_bounds = array<i64: 16, 512>}, {transform_indices = @transform_3, window_bounds = array<i64: 16, 512>}]} {
    %c0_i32 = arith.constant 0 : i32
    %0 = arith.cmpi eq, %arg1, %c0_i32 : i32
    %1 = arith.extui %0 : i1 to i32
    %c0_i32_0 = arith.constant 0 : i32
    %2 = arith.cmpi ne, %1, %c0_i32_0 : i32
    scf.if %2 {
      %cst_9 = arith.constant 0.000000e+00 : f32
      %12 = vector.broadcast %cst_9 : f32 to vector<16x512xf32>
      %c0_10 = arith.constant 0 : index
      %c0_11 = arith.constant 0 : index
      %13 = vector.load %arg6[%c0_10, %c0_11] : memref<16x512xf32, #tpu.memory_space<vmem>>, vector<16x512xf32>
      tpu.vector_store %arg6[%c0_10, %c0_11], %12 {strides = array<i32>} : memref<16x512xf32, #tpu.memory_space<vmem>>, vector<16x512xf32>,
    } else {
    }
    %c0 = arith.constant 0 : index
    %c0_1 = arith.constant 0 : index
    %3 = vector.load %arg6[%c0, %c0_1] : memref<16x512xf32, #tpu.memory_space<vmem>>, vector<16x512xf32>
    %c0_2 = arith.constant 0 : index
    %c0_3 = arith.constant 0 : index
    %4 = vector.load %arg2[%c0_2, %c0_3] : memref<16x1536xbf16, #tpu.memory_space<vmem>>, vector<16x1536xbf16>
    %c0_4 = arith.constant 0 : index
    %c0_5 = arith.constant 0 : index
    %5 = vector.load %arg3[%c0_4, %c0_5] : memref<1536x512xbf16, #tpu.memory_space<vmem>>, vector<1536x512xbf16>
    %cst = arith.constant dense<0.000000e+00> : vector<16x512xf32>
    %6 = tpu.matmul %4, %5, %cst {dimension_numbers = #tpu.dot_dimension_numbers<[1], [0], [0], [1], [0, 0, 1, 1], [], []>} : vector<16x1536xbf16>, vector<1536x512xbf16>, vector<16x512xf32> -> vector<16x512xf32>
    %7 = arith.addf %3, %6 : vector<16x512xf32>
    %c0_6 = arith.constant 0 : index
    %c0_7 = arith.constant 0 : index
    %8 = vector.load %arg6[%c0_6, %c0_7] : memref<16x512xf32, #tpu.memory_space<vmem>>, vector<16x512xf32>
    tpu.vector_store %arg6[%c0_6, %c0_7], %7 {strides = array<i32>} : memref<16x512xf32, #tpu.memory_space<vmem>>, vector<16x512xf32>,
    %c1_i32 = arith.constant 1 : i32
    %9 = arith.cmpi eq, %arg1, %c1_i32 : i32
    %10 = arith.extui %9 : i1 to i32
    %c0_i32_8 = arith.constant 0 : i32
    %11 = arith.cmpi ne, %10, %c0_i32_8 : i32
    scf.if %11 {
      %c0_9 = arith.constant 0 : index
      %c0_10 = arith.constant 0 : index
      %12 = vector.load %arg6[%c0_9, %c0_10] : memref<16x512xf32, #tpu.memory_space<vmem>>, vector<16x512xf32>
      %c0_11 = arith.constant 0 : index
      %c0_12 = arith.constant 0 : index
      %13 = vector.load %arg4[%c0_11, %c0_12] : memref<16x512xf32, #tpu.memory_space<vmem>>, vector<16x512xf32>
      %14 = arith.addf %12, %13 : vector<16x512xf32>
      %c0_13 = arith.constant 0 : index
      %c0_14 = arith.constant 0 : index
      %15 = vector.load %arg5[%c0_13, %c0_14] : memref<16x512xf32, #tpu.memory_space<vmem>>, vector<16x512xf32>
      tpu.vector_store %arg5[%c0_13, %c0_14], %14 {strides = array<i32>} : memref<16x512xf32, #tpu.memory_space<vmem>>, vector<16x512xf32>,
    } else {
    }
    return
  }
  func.func @transform_0(%arg0: i32, %arg1: i32) -> (i32, i32) {
    %c0_i32 = arith.constant 0 : i32
    %c0_i32_0 = arith.constant 0 : i32
    return %c0_i32, %arg1 : i32, i32
  }
  func.func @transform_1(%arg0: i32, %arg1: i32) -> (i32, i32) {
    %c0_i32 = arith.constant 0 : i32
    return %arg1, %arg0 : i32, i32
  }
  func.func @transform_2(%arg0: i32, %arg1: i32) -> (i32, i32) {
    %c0_i32 = arith.constant 0 : i32
    %c0_i32_0 = arith.constant 0 : i32
    return %c0_i32, %arg0 : i32, i32
  }
  func.func @transform_3(%arg0: i32, %arg1: i32) -> (i32, i32) {
    %c0_i32 = arith.constant 0 : i32
    %c0_i32_0 = arith.constant 0 : i32
    return %c0_i32, %arg0 : i32, i32
  }
}

</mosaic_0001>

<bundles_post_ra>
// kernel: tpu_custom_call.1
= control target key start
LH: loop header
LB: loop body
LE: loop exit
PB: predicated region body
PF: predicated region fallthrough
CT: control target
= control target key end

     0   :  { %s5318_s0 = inlined_call_operand.hbm [shape: bf16[16,3072], index: 0, kind: input, shape index: {}]   ;;  %s5319_s1 = inlined_call_operand.hbm [shape: bf16[3072,512], index: 1, kind: input, shape index: {}]   ;;  %s5320_s2 = inlined_call_operand.hbm [shape: f32[16,512], index: 2, kind: input, shape index: {}]   ;;  %s5321_s3 = inlined_call_operand.hbm [shape: f32[16,512], index: 3, kind: output, shape index: {}]  }
   0x1   :  { %5326 = sst [smem:[#allocation14_spill]] %s5318_s0 }
   0x2   :  { %8 = vsyncpa [#allocation4], 0 }
   0x3   :  { %10 = vsyncpa [#allocation4 + $0x1], 0 }
   0x4   :  { %11 = vsyncpa [#allocation7], 0 }
   0x5   :  { %13 = vsyncpa [#allocation7 + $0x1], 0 }
   0x6   :  { %14 = vsyncpa [#allocation5], 0  ;;  %s4693_s12 = smov 0   ;;  %s4695_s13 = smov 0  }
   0x7   :  { %s4697_s14 = smov 0   ;;  %s4699_s15 = smov 0  }
   0x8   :  { %s4701_s16 = smov 0   ;;  %s4703_s17 = smov 0  }
   0x9 LB: > { %s4722_s18 = sadd.s32 4294967295, %s4657_s17   ;;  %s39_s19 = sadd.s32 1, %s4645_s14  ;;  %s4657_s17 = sphi %s4703_s17, %s20_s17   ;;  %s4653_s16 = sphi %s4701_s16, %s5341_s16   ;;  %s4649_s15 = sphi %s4699_s15, %s5340_s15   ;;  %s4645_s14 = sphi %s4697_s14, %s5339_s14   ;;  %s4641_s13 = sphi %s4695_s13, %s5338_s13   ;;  %s4637_s12 = sphi %s4693_s12, %s5337_s12  }
   0xa   : > { %p46_p0 = scmp.ne.s32.totalorder %s4645_s14, %s4641_s13  ;;  %p47_p1 = scmp.eq.s32.totalorder %s4657_s17, 0 }
   0xb   : > { %p52_p2 = scmp.ne.s32.totalorder %s4641_s13, %s4637_s12  ;;  %p5322_p3 = scmp.eq.s32.totalorder %s4722_s18, 0 }
   0xc   : > { %p48_p4 = por %p47_p1, %p46_p0  ;;  %p3341_p5 = scmp.ge.s32.totalorder %s4657_s17, 1 }
   0xd   : > { %p4733_p6 = por %p5322_p3, %p52_p2  ;;  %p143_p7 = scmp.lt.s32.totalorder %s4657_s17, 3 }
   0xe   : > { %s4659_s22 = smov [#allocation8]   ;;  %p3823_p10 = scmp.lt.s32.totalorder %s4657_s17, 2 }
   0xf   : > { %s5327_s20 = scalar_select %p4733_p6, 1, 0 }
  0x10   : > { %p4738_p8 = pnand %p3341_p5, %p143_p7  ;;  %s158_s23 = sshll.u32 %s4659_s22, 4  ;;  %s159_s23 = int_to_ptr.vmem [resolvable:$true] %s158_s23 }
  0x11   : > { %p4751_p12 = pnand %p3823_p10, %p48_p4  ;;  %s29_s26 = sadd.s32 1, %s4653_s16 }
  0x12   : > { %s5328_s21 = scalar_select %p4738_p8, 1, 0 }
  0x13   : > { %p3811_p9 = pneg %p4738_p8  ;;  %s4481_s29 = scalar_lea.hbm %s5320_s2, 1024 }
  0x14   : > { %s5330_s25 = scalar_select %p4751_p12, 1, 0 }
  0x15   : > { %p4747_p11 = pnand %p3811_p9, %p5322_p3  ;;  %p4482_p13 = scmp.ne.s32.totalorder %s5320_s2, %s4481_s29 }
  0x16   : > { %p4488_p4 = scmp.lt.u32.totalorder %s4481_s29, %s5320_s2 }
  0x17   : > { %p4483_p0 = pneg %p4747_p11 }
  0x19   : > { %p4484_p1 = pnand %p4483_p0, %p4482_p13 }
  0x1b   : > { %p4485_p2 = pneg %p4484_p1 }
  0x1d   : > { %p4490_p5 = pnand %p4488_p4, %p4485_p2 }
  0x1f   : > { %4493 = shalt.err (!%p4490_p5)
}
  0x20   : > { %s4494_s7 = scalar_lea.vmem %s159_s23, 1024  ;;  %p4502_p3 = scmp.lt.s32.totalorder %s159_s23, %s159_s23 }
  0x21   : > { %p4495_p7 = scmp.ne.s32.totalorder %s159_s23, %s4494_s7  ;;  %p4503_p6 = scmp.lt.s32.totalorder %s4494_s7, %s4494_s7 }
  0x23   : > { %p4497_p9 = pnand %p4495_p7, %p4483_p0  ;;  %p4504_p8 = por %p4503_p6, %p4502_p3 }
  0x25   : > { %p4498_p10 = pneg %p4497_p9 }
  0x27   : > { %p4505_p12 = pnand %p4504_p8, %p4498_p10 }
  0x29   : > { %4508 = shalt.err (!%p4505_p12)
}
  0x2a   : > { %s4660_s8 = smov 512   ;;  %s4661_s9 = smov 32  }
  0x2b   : > { %3814 = dma.hbm_to_vmem [thread:$0]  (!%p4747_p11), %s5320_s2, 1024, %s159_s23, [#allocation7], %s4660_s8, %s4660_s8, %s4661_s9  }
  0x2c   : > { %p30_p13 = scmp.ge.s32.totalorder %s29_s26, 2  ;;  %s4773_s12 = sand.u32 1, %s4645_s14  }
  0x2d   : > { %s3751_s22 = smul.u32 768, %s4653_s16  ;;  %s5331_s0 = sld [smem:[#allocation14_spill]] }
  0x2e   : > { %s5343_s26 = smov (%p30_p13, %s29_s26), 0  ;;  %s3795_s27 = smul.u32 96, %s4773_s12 }
  0x2f   : > { %s36_s28 = ssub.s32 %s4653_s16, %s5343_s26  ;;  %s193_s6 = sand.u32 1, %s4657_s17  }
  0x30   : > { %p37_p3 = scmp.eq.s32.totalorder %s36_s28, 0  ;;  %s176_s23 = scalar_lea.vmem [#allocation3], %s3795_s27 }
  0x31   : > { %s183_s4 = sshll.u32 %s176_s23, 4  ;;  %s173_s7 = scalar_lea.sflag [#allocation4], %s4773_s12  ;;  %s4791_s4 = int_to_ptr.vmem [resolvable:$true] %s183_s4 }
  0x32   : > { %s4789_s5 = scalar_select %p37_p3, %s4645_s14, %s39_s19  }
  0x33   : > { %s4784_s24 = scalar_lea.hbm %s5331_s0, %s3751_s22  ;;  %p5332_p8 = scmp.ne.s32.totalorder %s5330_s25, 0 }
  0x34   : > { %s4509_s8 = scalar_lea.hbm %s4784_s24, 1536  ;;  %s4514_s11 = scalar_lea.hbm %s5331_s0, 3072 }
  0x35   : > { %p4510_p6 = scmp.ne.s32.totalorder %s4784_s24, %s4509_s8  ;;  %p4511_p11 = pneg %p5332_p8 }
  0x36   : > { %p4515_p1 = scmp.lt.u32.totalorder %s4784_s24, %s5331_s0  ;;  %p4516_p2 = scmp.lt.u32.totalorder %s4514_s11, %s4509_s8 }
  0x37   : > { %p4512_p12 = pnand %p4511_p11, %p4510_p6  ;;  %p4518_p5 = scmp.lt.u32.totalorder %s4509_s8, %s4784_s24 }
  0x38   : > { %p4517_p4 = por %p4516_p2, %p4515_p1 }
  0x39   : > { %p4513_p0 = pneg %p4512_p12 }
  0x3a   : > { %p4519_p7 = por %p4518_p5, %p4517_p4 }
  0x3c   : > { %p4520_p9 = pnand %p4519_p7, %p4513_p0 }
  0x3e   : > { %4523 = shalt.err (!%p4520_p9)
}
  0x3f   : > { %s4524_s19 = scalar_lea.vmem %s4791_s4, 1536  ;;  %s4662_s28 = smov [#allocation3]  }
  0x40   : > { %p4525_p10 = scmp.ne.s32.totalorder %s4791_s4, %s4524_s19  ;;  %s4529_s29 = sshll.u32 %s4662_s28, 4  ;;  %s4530_s29 = int_to_ptr.vmem [resolvable:$false] %s4529_s29 }
  0x41   : > { %s4531_s30 = scalar_lea.vmem %s4530_s29, 3072  ;;  %p4532_p6 = scmp.lt.s32.totalorder %s4791_s4, %s4530_s29 }
  0x42   : > { %p4527_p13 = pnand %p4525_p10, %p4511_p11  ;;  %p4533_p12 = scmp.lt.s32.totalorder %s4531_s30, %s4524_s19 }
  0x44   : > { %p4528_p3 = pneg %p4527_p13  ;;  %p4534_p1 = por %p4533_p12, %p4532_p6 }
  0x46   : > { %p4535_p2 = pnand %p4534_p1, %p4528_p3 }
  0x48   : > { %4538 = shalt.err (!%p4535_p2)
}
  0x49   : > { %s4663_s23 = smov 1536   ;;  %s4664_s8 = smov 768  }
  0x4a   : > { %s4665_s9 = smov 48   ;;  %s3796_s10 = smul.u32 3072, %s4773_s12 }
  0x4b   : > { %3818 = dma.hbm_to_vmem [thread:$0]  (!%p5332_p8), %s4784_s24, 1536, %s4791_s4, %s173_s7, %s4663_s23, %s4664_s8, %s4665_s9  }
  0x4c   : > { %s3754_s11 = smul.u32 49152, %s4653_s16  ;;  %s197_s28 = scalar_lea.vmem [#allocation6], %s3796_s10 }
  0x4d   : > { %s207_s29 = sshll.u32 %s197_s28, 4  ;;  %s4833_s30 = scalar_lea.sflag [#allocation7], %s193_s6  ;;  %s4829_s29 = int_to_ptr.vmem [resolvable:$true] %s207_s29 }
  0x4e   : > { %s4827_s19 = scalar_lea.hbm %s5319_s1, %s3754_s11  ;;  %s4544_s4 = scalar_lea.hbm %s5319_s1, 98304 }
  0x4f   : > { %s4539_s0 = scalar_lea.hbm %s4827_s19, 49152  ;;  %p4545_p7 = scmp.lt.u32.totalorder %s4827_s19, %s5319_s1 }
  0x50   : > { %p4540_p0 = scmp.ne.s32.totalorder %s4827_s19, %s4539_s0  ;;  %p4546_p9 = scmp.lt.u32.totalorder %s4544_s4, %s4539_s0 }
  0x51   : > { %p4548_p13 = scmp.lt.u32.totalorder %s4539_s0, %s4827_s19 }
  0x52   : > { %p4542_p4 = pnand %p4540_p0, %p4511_p11  ;;  %p4547_p10 = por %p4546_p9, %p4545_p7 }
  0x54   : > { %p4543_p5 = pneg %p4542_p4  ;;  %p4549_p3 = por %p4548_p13, %p4547_p10 }
  0x56   : > { %p4550_p6 = pnand %p4549_p3, %p4543_p5 }
  0x58   : > { %4553 = shalt.err (!%p4550_p6)
}
  0x59   : > { %s4554_s6 = scalar_lea.vmem %s4829_s29, 49152  ;;  %s4666_s8 = smov [#allocation6]  }
  0x5a   : > { %p4555_p12 = scmp.ne.s32.totalorder %s4829_s29, %s4554_s6  ;;  %s4559_s9 = sshll.u32 %s4666_s8, 4  ;;  %s4560_s9 = int_to_ptr.vmem [resolvable:$false] %s4559_s9 }
  0x5b   : > { %s4561_s10 = scalar_lea.vmem %s4560_s9, 98304  ;;  %p4562_p0 = scmp.lt.s32.totalorder %s4829_s29, %s4560_s9 }
  0x5c   : > { %p4557_p1 = pnand %p4555_p12, %p4511_p11  ;;  %p4563_p4 = scmp.lt.s32.totalorder %s4561_s10, %s4554_s6 }
  0x5e   : > { %p4558_p2 = pneg %p4557_p1  ;;  %p4564_p7 = por %p4563_p4, %p4562_p0 }
  0x60   : > { %p4565_p9 = pnand %p4564_p7, %p4558_p2 }
  0x62   : > { %4568 = shalt.err (!%p4565_p9)
}
  0x63   : > { %s4667_s0 = smov 256   ;;  %s4668_s11 = smov 16  }
  0x64   : > { %3821 = dma.hbm_to_vmem [thread:$0]  (!%p5332_p8), %s4827_s19, 49152, %s4829_s29, %s4833_s30, %s4667_s0, %s4667_s0, %s4668_s11  }
  0x65   : > { %p5333_p11 = scmp.ne.s32.totalorder %s5328_s21, 0 }
  0x66   : > { %s221_s22 = sand.u32 (!%p5333_p11), 1, %s4641_s13   ;;  %p5334_p5 = scmp.ne.s32.totalorder (!%p5333_p11), %s5327_s20, 0 }
  0x67   : > { %219 = sbr.rel (%p5333_p11) target bundleno = 766 (0x2fe), region = 32  ;;  %s222_s28 = scalar_lea.sflag (!%p5333_p11), [#allocation4], %s221_s22 }
  0x68   : > { %s3797_s27 = smul.u32 (!%p5333_p11), 96, %s221_s22 }
  0x6a   : > { %s4862_s12 = scalar_lea.vmem (!%p5333_p11), [#allocation3], %s3797_s27 }
  0x6e   : > { %4620 = dma.done.wait (%p5334_p5), %s222_s28, 1536  }
  0x6f   : > { %4622 = vsyncadd (%p5334_p5), %s222_s28, 4294965760  ;;  %s230_s24 = sand.u32 1, %s4722_s18   ;;  %s3798_s25 = smul.u32 3072, %s221_s22 }
  0x70   : > { %s231_s19 = scalar_lea.sflag [#allocation7], %s230_s24 }
  0x71   : > { %s4869_s29 = scalar_lea.vmem [#allocation6], %s3798_s25 }
  0x72   : > { %4624 = dma.done.wait (%p5334_p5), %s231_s19, 49152  }
  0x73   : > { %4626 = vsyncadd (%p5334_p5), %s231_s19, 4294918144  ;;  %p5335_p8 = scmp.eq.s32.totalorder %s4722_s18, 0 }
  0x75   : > { %4628 = dma.done.wait (%p5335_p8), [#allocation7], 1024   ;;  %p5336_p10 = pmov %p5335_p8 }
  0x76   : > { %p3349_p13 = scmp.ne.s32.totalorder %s4649_s15, 0 }
  0x77   : > { %4630 = vsyncadd (%p5336_p10), [#allocation7], 4294966272  ;;  %v4669_v0 = vmov (!%p3349_p13), 0.0  }
  0x78   : > { %269 = sbr.rel (%p3349_p13) target bundleno = 127 (0x7f), region = 48  ;;  %270 = vst [vmem:[#allocation2] sm:$0xff] (!%p3349_p13), %v4669_v0  ;;  %271 = vst [vmem:[#allocation2 + $0x8] sm:$0xff] (!%p3349_p13), %v4669_v0 }
  0x79   : > { %272 = vst [vmem:[#allocation2 + $0x10] sm:$0xff] (!%p3349_p13), %v4669_v0  ;;  %273 = vst [vmem:[#allocation2 + $0x18] sm:$0xff] (!%p3349_p13), %v4669_v0 }
  0x7a   : > { %274 = vst [vmem:[#allocation2 + $0x20] sm:$0xff] (!%p3349_p13), %v4669_v0  ;;  %275 = vst [vmem:[#allocation2 + $0x28] sm:$0xff] (!%p3349_p13), %v4669_v0 }
  0x7b   : > { %276 = vst [vmem:[#allocation2 + $0x30] sm:$0xff] (!%p3349_p13), %v4669_v0  ;;  %277 = vst [vmem:[#allocation2 + $0x38] sm:$0xff] (!%p3349_p13), %v4669_v0 }
  0x7f PF: > { %v3887_v1 = vld [vmem:[%s4869_s29 + $0x4] ss:$16 sps:$4 sm:$0xff]   ;;  %v3889_v2 = vld [vmem:[%s4869_s29 + $0xc] ss:$16 sps:$4 sm:$0xff]   ;;  %v3891_v3 = vld [vmem:[%s4869_s29] ss:$16 sps:$4 sm:$0xff]  }
  0x80   : > { %2662 = vmatprep.subr.bf16.mxu0 %v3887_v1  ;;  %v3892_v4 = vld [vmem:[%s4869_s29 + $0x8] ss:$16 sps:$4 sm:$0xff]   ;;  %2920 = vmatprep.subr.bf16.mxu1 %v3889_v2  ;;  %v3893_v5 = vld [vmem:[%s4869_s29 + $0x24] ss:$16 sps:$4 sm:$0xff]   ;;  %v3895_v6 = vld [vmem:[%s4869_s29 + $0x2c] ss:$16 sps:$4 sm:$0xff]  }
  0x81   : > { %2663 = vmatpush1.bf16.msra.mxu0 %v3891_v3  ;;  %2921 = vmatpush1.bf16.msra.mxu1 %v3892_v4  ;;  %v3897_v7 = vld [vmem:[%s4869_s29 + $0x20] ss:$16 sps:$4 sm:$0xff]   ;;  %v3898_v8 = vld [vmem:[%s4869_s29 + $0x28] ss:$16 sps:$4 sm:$0xff]   ;;  %v3899_v9 = vld [vmem:[%s4869_s29 + $0x44] ss:$16 sps:$4 sm:$0xff]  }
  0x82   : > { %2664 = vmatprep.subr.bf16.mxu0 %v3893_v5  ;;  %2922 = vmatprep.subr.bf16.mxu1 %v3895_v6  ;;  %v3901_v10 = vld [vmem:[%s4869_s29 + $0x4c] ss:$16 sps:$4 sm:$0xff]   ;;  %v3903_v11 = vld [vmem:[%s4869_s29 + $0x40] ss:$16 sps:$4 sm:$0xff]   ;;  %v3904_v12 = vld [vmem:[%s4869_s29 + $0x48] ss:$16 sps:$4 sm:$0xff]  }
  0x83   : > { %v3905_v13 = vld [vmem:[%s4869_s29 + $0x64] ss:$16 sps:$4 sm:$0xff]   ;;  %v3907_v14 = vld [vmem:[%s4869_s29 + $0x6c] ss:$16 sps:$4 sm:$0xff]   ;;  %v3909_v15 = vld [vmem:[%s4869_s29 + $0x60] ss:$16 sps:$4 sm:$0xff]  }
  0x84   : > { %v3910_v16 = vld [vmem:[%s4869_s29 + $0x68] ss:$16 sps:$4 sm:$0xff]   ;;  %v3911_v17 = vld [vmem:[%s4869_s29 + $0x84] ss:$16 sps:$4 sm:$0xff]   ;;  %v3913_v18 = vld [vmem:[%s4869_s29 + $0x8c] ss:$16 sps:$4 sm:$0xff]  }
  0x85   : > { %2665 = vmatpush1.bf16.msra.mxu0 %v3897_v7  ;;  %2923 = vmatpush1.bf16.msra.mxu1 %v3898_v8  ;;  %v3915_v19 = vld [vmem:[%s4869_s29 + $0x80] ss:$16 sps:$4 sm:$0xff]   ;;  %v3916_v20 = vld [vmem:[%s4869_s29 + $0x88] ss:$16 sps:$4 sm:$0xff]   ;;  %v3917_v21 = vld [vmem:[%s4869_s29 + $0xa4] ss:$16 sps:$4 sm:$0xff]  }
  0x86   : > { %2666 = vmatprep.subr.bf16.mxu0 %v3899_v9  ;;  %2924 = vmatprep.subr.bf16.mxu1 %v3901_v10  ;;  %v3919_v22 = vld [vmem:[%s4869_s29 + $0xac] ss:$16 sps:$4 sm:$0xff]   ;;  %v3921_v23 = vld [vmem:[%s4869_s29 + $0xa0] ss:$16 sps:$4 sm:$0xff]   ;;  %v3922_v24 = vld [vmem:[%s4869_s29 + $0xa8] ss:$16 sps:$4 sm:$0xff]  }
  0x87   : > { %v3923_v25 = vld [vmem:[%s4869_s29 + $0xc4] ss:$16 sps:$4 sm:$0xff]   ;;  %v3925_v26 = vld [vmem:[%s4869_s29 + $0xcc] ss:$16 sps:$4 sm:$0xff]   ;;  %v3927_v27 = vld [vmem:[%s4869_s29 + $0xc0] ss:$16 sps:$4 sm:$0xff]  }
  0x88   : > { %v3928_v28 = vld [vmem:[%s4869_s29 + $0xc8] ss:$16 sps:$4 sm:$0xff]   ;;  %v3929_v29 = vld [vmem:[%s4869_s29 + $0xe4] ss:$16 sps:$4 sm:$0xff]   ;;  %v3931_v30 = vld [vmem:[%s4869_s29 + $0xec] ss:$16 sps:$4 sm:$0xff]  }
  0x89   : > { %2667 = vmatpush1.bf16.msra.mxu0 %v3903_v11  ;;  %2925 = vmatpush1.bf16.msra.mxu1 %v3904_v12  ;;  %v3933_v31 = vld [vmem:[%s4869_s29 + $0xe0] ss:$16 sps:$4 sm:$0xff]   ;;  %v3934_v32 = vld [vmem:[%s4869_s29 + $0xe8] ss:$16 sps:$4 sm:$0xff]   ;;  %v3935_v33 = vld [vmem:[%s4869_s29 + $0x104] ss:$16 sps:$4 sm:$0xff]  }
  0x8a   : > { %2668 = vmatprep.subr.bf16.mxu0 %v3905_v13  ;;  %2926 = vmatprep.subr.bf16.mxu1 %v3907_v14  ;;  %v3937_v34 = vld [vmem:[%s4869_s29 + $0x10c] ss:$16 sps:$4 sm:$0xff]   ;;  %v3939_v35 = vld [vmem:[%s4869_s29 + $0x100] ss:$16 sps:$4 sm:$0xff]   ;;  %v3940_v36 = vld [vmem:[%s4869_s29 + $0x108] ss:$16 sps:$4 sm:$0xff]  }
  0x8b   : > { %v3941_v37 = vld [vmem:[%s4869_s29 + $0x124] ss:$16 sps:$4 sm:$0xff]   ;;  %v3943_v38 = vld [vmem:[%s4869_s29 + $0x12c] ss:$16 sps:$4 sm:$0xff]   ;;  %v3945_v39 = vld [vmem:[%s4869_s29 + $0x120] ss:$16 sps:$4 sm:$0xff]  }
  0x8c   : > { %v3946_v40 = vld [vmem:[%s4869_s29 + $0x128] ss:$16 sps:$4 sm:$0xff]   ;;  %v3947_v41 = vld [vmem:[%s4869_s29 + $0x144] ss:$16 sps:$4 sm:$0xff]   ;;  %v3949_v42 = vld [vmem:[%s4869_s29 + $0x14c] ss:$16 sps:$4 sm:$0xff]  }
  0x8d   : > { %2669 = vmatpush1.bf16.msra.mxu0 %v3909_v15  ;;  %2927 = vmatpush1.bf16.msra.mxu1 %v3910_v16  ;;  %v3951_v43 = vld [vmem:[%s4869_s29 + $0x140] ss:$16 sps:$4 sm:$0xff]   ;;  %v3952_v44 = vld [vmem:[%s4869_s29 + $0x148] ss:$16 sps:$4 sm:$0xff]   ;;  %v3953_v45 = vld [vmem:[%s4869_s29 + $0x164] ss:$16 sps:$4 sm:$0xff]  }
  0x8e   : > { %2670 = vmatprep.subr.bf16.mxu0 %v3911_v17  ;;  %2928 = vmatprep.subr.bf16.mxu1 %v3913_v18  ;;  %v3955_v46 = vld [vmem:[%s4869_s29 + $0x16c] ss:$16 sps:$4 sm:$0xff]   ;;  %v3957_v47 = vld [vmem:[%s4869_s29 + $0x160] ss:$16 sps:$4 sm:$0xff]   ;;  %v3958_v48 = vld [vmem:[%s4869_s29 + $0x168] ss:$16 sps:$4 sm:$0xff]  }
  0x8f   : > { %v3985_v49 = vld [vmem:[%s4862_s12 + $0x4] ss:$48 sps:$4 sm:$0xff]   ;;  %v3961_v51 = vld [vmem:[%s4869_s29 + $0x18c] ss:$16 sps:$4 sm:$0xff]   ;;  %v3963_v52 = vld [vmem:[%s4869_s29 + $0x180] ss:$16 sps:$4 sm:$0xff]  }
  0x90   : > { %v3959_v50 = vld [vmem:[%s4869_s29 + $0x184] ss:$16 sps:$4 sm:$0xff]   ;;  %2694 = vmatprep.mubr.bf16.mxu0 %v3985_v49  ;;  %2952 = vmatprep.mubr.bf16.mxu1 %v3985_v49  ;;  %v3964_v53 = vld [vmem:[%s4869_s29 + $0x188] ss:$16 sps:$4 sm:$0xff]   ;;  %v3967_v55 = vld [vmem:[%s4869_s29 + $0x1ac] ss:$16 sps:$4 sm:$0xff]  }
  0x91   : > { %2671 = vmatpush1.bf16.msra.mxu0 %v3915_v19  ;;  %2929 = vmatpush1.bf16.msra.mxu1 %v3916_v20  ;;  %v3965_v54 = vld [vmem:[%s4869_s29 + $0x1a4] ss:$16 sps:$4 sm:$0xff]   ;;  %v3969_v56 = vld [vmem:[%s4869_s29 + $0x1a0] ss:$16 sps:$4 sm:$0xff]   ;;  %v3970_v57 = vld [vmem:[%s4869_s29 + $0x1a8] ss:$16 sps:$4 sm:$0xff]  }
  0x92   : > { %2672 = vmatprep.subr.bf16.mxu0 %v3917_v21  ;;  %2930 = vmatprep.subr.bf16.mxu1 %v3919_v22  ;;  %v3971_v58 = vld [vmem:[%s4869_s29 + $0x1c4] ss:$16 sps:$4 sm:$0xff]   ;;  %v3973_v59 = vld [vmem:[%s4869_s29 + $0x1cc] ss:$16 sps:$4 sm:$0xff]   ;;  %v3975_v60 = vld [vmem:[%s4869_s29 + $0x1c0] ss:$16 sps:$4 sm:$0xff]  }
  0x93   : > { %v3976_v61 = vld [vmem:[%s4869_s29 + $0x1c8] ss:$16 sps:$4 sm:$0xff]   ;;  %v3977_v62 = vld [vmem:[%s4869_s29 + $0x1e4] ss:$16 sps:$4 sm:$0xff]   ;;  %v3979_v63 = vld [vmem:[%s4869_s29 + $0x1ec] ss:$16 sps:$4 sm:$0xff]  }
  0x94   : > { %v3981_v0 = vld [vmem:[%s4869_s29 + $0x1e0] ss:$16 sps:$4 sm:$0xff]   ;;  %v3982_v1 = vld [vmem:[%s4869_s29 + $0x1e8] ss:$16 sps:$4 sm:$0xff]   ;;  %v3988_v2 = vld [vmem:[%s4869_s29 + $0x204] ss:$16 sps:$4 sm:$0xff]  }
  0x95   : > { %2673 = vmatpush1.bf16.msra.mxu0 %v3921_v23  ;;  %2931 = vmatpush1.bf16.msra.mxu1 %v3922_v24  ;;  %v3991_v3 = vld [vmem:[%s4869_s29 + $0x20c] ss:$16 sps:$4 sm:$0xff]   ;;  %v3983_v4 = vld [vmem:[%s4862_s12] ss:$48 sps:$4 sm:$0xff]   ;;  %v3989_v6 = vld [vmem:[%s4869_s29 + $0x208] ss:$16 sps:$4 sm:$0xff]  }
  0x96   : > { %2674 = vmatprep.subr.bf16.mxu0 %v3923_v25  ;;  %2932 = vmatprep.subr.bf16.mxu1 %v3925_v26  ;;  %v3986_v5 = vld [vmem:[%s4869_s29 + $0x200] ss:$16 sps:$4 sm:$0xff]   ;;  %v3994_v7 = vld [vmem:[%s4869_s29 + $0x224] ss:$16 sps:$4 sm:$0xff]   ;;  %v3997_v8 = vld [vmem:[%s4869_s29 + $0x22c] ss:$16 sps:$4 sm:$0xff]  }
  0x97   : > { %v3992_v9 = vld [vmem:[%s4869_s29 + $0x220] ss:$16 sps:$4 sm:$0xff]   ;;  %v3995_v10 = vld [vmem:[%s4869_s29 + $0x228] ss:$16 sps:$4 sm:$0xff]   ;;  %v4000_v11 = vld [vmem:[%s4869_s29 + $0x244] ss:$16 sps:$4 sm:$0xff]  }
  0x98   : > { %v4003_v12 = vld [vmem:[%s4869_s29 + $0x24c] ss:$16 sps:$4 sm:$0xff]   ;;  %v3998_v13 = vld [vmem:[%s4869_s29 + $0x240] ss:$16 sps:$4 sm:$0xff]   ;;  %v4001_v14 = vld [vmem:[%s4869_s29 + $0x248] ss:$16 sps:$4 sm:$0xff]  }
  0x99   : > { %2675 = vmatpush1.bf16.msra.mxu0 %v3927_v27  ;;  %2933 = vmatpush1.bf16.msra.mxu1 %v3928_v28  ;;  %v4006_v15 = vld [vmem:[%s4869_s29 + $0x264] ss:$16 sps:$4 sm:$0xff]   ;;  %v4009_v16 = vld [vmem:[%s4869_s29 + $0x26c] ss:$16 sps:$4 sm:$0xff]   ;;  %v4004_v17 = vld [vmem:[%s4869_s29 + $0x260] ss:$16 sps:$4 sm:$0xff]  }
  0x9a   : > { %2676 = vmatprep.subr.bf16.mxu0 %v3929_v29  ;;  %2934 = vmatprep.subr.bf16.mxu1 %v3931_v30  ;;  %v4007_v18 = vld [vmem:[%s4869_s29 + $0x268] ss:$16 sps:$4 sm:$0xff]   ;;  %v4012_v19 = vld [vmem:[%s4869_s29 + $0x284] ss:$16 sps:$4 sm:$0xff]   ;;  %v4015_v20 = vld [vmem:[%s4869_s29 + $0x28c] ss:$16 sps:$4 sm:$0xff]  }
  0x9b   : > { %v4010_v21 = vld [vmem:[%s4869_s29 + $0x280] ss:$16 sps:$4 sm:$0xff]   ;;  %v4013_v22 = vld [vmem:[%s4869_s29 + $0x288] ss:$16 sps:$4 sm:$0xff]   ;;  %v4018_v23 = vld [vmem:[%s4869_s29 + $0x2a4] ss:$16 sps:$4 sm:$0xff]  }
  0x9c   : > { %v4021_v24 = vld [vmem:[%s4869_s29 + $0x2ac] ss:$16 sps:$4 sm:$0xff]   ;;  %v4016_v25 = vld [vmem:[%s4869_s29 + $0x2a0] ss:$16 sps:$4 sm:$0xff]   ;;  %v4019_v26 = vld [vmem:[%s4869_s29 + $0x2a8] ss:$16 sps:$4 sm:$0xff]  }
  0x9d   : > { %2677 = vmatpush1.bf16.msra.mxu0 %v3933_v31  ;;  %2935 = vmatpush1.bf16.msra.mxu1 %v3934_v32  ;;  %v4024_v27 = vld [vmem:[%s4869_s29 + $0x2c4] ss:$16 sps:$4 sm:$0xff]   ;;  %v4027_v28 = vld [vmem:[%s4869_s29 + $0x2cc] ss:$16 sps:$4 sm:$0xff]   ;;  %v4022_v29 = vld [vmem:[%s4869_s29 + $0x2c0] ss:$16 sps:$4 sm:$0xff]  }
  0x9e   : > { %2678 = vmatprep.subr.bf16.mxu0 %v3935_v33  ;;  %2936 = vmatprep.subr.bf16.mxu1 %v3937_v34  ;;  %v4025_v30 = vld [vmem:[%s4869_s29 + $0x2c8] ss:$16 sps:$4 sm:$0xff]   ;;  %v4084_v31 = vld [vmem:[%s4862_s12 + $0xc] ss:$48 sps:$4 sm:$0xff]   ;;  %v4030_v32 = vld [vmem:[%s4869_s29 + $0x2e4] ss:$16 sps:$4 sm:$0xff]  }
  0x9f   : > { %v4033_v33 = vld [vmem:[%s4869_s29 + $0x2ec] ss:$16 sps:$4 sm:$0xff]   ;;  %v4028_v34 = vld [vmem:[%s4869_s29 + $0x2e0] ss:$16 sps:$4 sm:$0xff]   ;;  %p3746_p3 = scmp.ne.s32.totalorder %s4649_s15, 1 }
  0xa0   : > { %v4057_v49 = vld [vmem:[%s4869_s29 + $0x36c] ss:$16 sps:$4 sm:$0xff]  }
  0xa1   : > { %2679 = vmatpush1.bf16.msra.mxu0 %v3939_v35  ;;  %2937 = vmatpush1.bf16.msra.mxu1 %v3940_v36  ;;  %v4031_v35 = vld [vmem:[%s4869_s29 + $0x2e8] ss:$16 sps:$4 sm:$0xff]   ;;  %v4036_v36 = vld [vmem:[%s4869_s29 + $0x304] ss:$16 sps:$4 sm:$0xff]  }
  0xa2   : > { %2680 = vmatprep.subr.bf16.mxu0 %v3941_v37  ;;  %2938 = vmatprep.subr.bf16.mxu1 %v3943_v38  ;;  %v4039_v37 = vld [vmem:[%s4869_s29 + $0x30c] ss:$16 sps:$4 sm:$0xff]   ;;  %v4034_v38 = vld [vmem:[%s4869_s29 + $0x300] ss:$16 sps:$4 sm:$0xff]  }
  0xa5   : > { %2681 = vmatpush1.bf16.msra.mxu0 %v3945_v39  ;;  %2939 = vmatpush1.bf16.msra.mxu1 %v3946_v40  ;;  %v4037_v39 = vld [vmem:[%s4869_s29 + $0x308] ss:$16 sps:$4 sm:$0xff]   ;;  %v4042_v40 = vld [vmem:[%s4869_s29 + $0x324] ss:$16 sps:$4 sm:$0xff]  }
  0xa6   : > { %2682 = vmatprep.subr.bf16.mxu0 %v3947_v41  ;;  %2940 = vmatprep.subr.bf16.mxu1 %v3949_v42  ;;  %v4045_v41 = vld [vmem:[%s4869_s29 + $0x32c] ss:$16 sps:$4 sm:$0xff]   ;;  %v4040_v42 = vld [vmem:[%s4869_s29 + $0x320] ss:$16 sps:$4 sm:$0xff]  }
  0xa9   : > { %2683 = vmatpush1.bf16.msra.mxu0 %v3951_v43  ;;  %2941 = vmatpush1.bf16.msra.mxu1 %v3952_v44  ;;  %v4043_v43 = vld [vmem:[%s4869_s29 + $0x328] ss:$16 sps:$4 sm:$0xff]   ;;  %v4048_v44 = vld [vmem:[%s4869_s29 + $0x344] ss:$16 sps:$4 sm:$0xff]  }
  0xaa   : > { %2684 = vmatprep.subr.bf16.mxu0 %v3953_v45  ;;  %2942 = vmatprep.subr.bf16.mxu1 %v3955_v46  ;;  %v4051_v45 = vld [vmem:[%s4869_s29 + $0x34c] ss:$16 sps:$4 sm:$0xff]   ;;  %v4046_v46 = vld [vmem:[%s4869_s29 + $0x340] ss:$16 sps:$4 sm:$0xff]  }
  0xad   : > { %2685 = vmatpush1.bf16.msra.mxu0 %v3957_v47  ;;  %2943 = vmatpush1.bf16.msra.mxu1 %v3958_v48  ;;  %v4049_v47 = vld [vmem:[%s4869_s29 + $0x348] ss:$16 sps:$4 sm:$0xff]   ;;  %v4054_v48 = vld [vmem:[%s4869_s29 + $0x364] ss:$16 sps:$4 sm:$0xff]  }
  0xae   : > { %2686 = vmatprep.subr.bf16.mxu0 %v3959_v50  ;;  %2944 = vmatprep.subr.bf16.mxu1 %v3961_v51  ;;  %v4052_v50 = vld [vmem:[%s4869_s29 + $0x360] ss:$16 sps:$4 sm:$0xff]   ;;  %v4055_v51 = vld [vmem:[%s4869_s29 + $0x368] ss:$16 sps:$4 sm:$0xff]  }
  0xb1   : > { %2687 = vmatpush1.bf16.msra.mxu0 %v3963_v52  ;;  %2945 = vmatpush1.bf16.msra.mxu1 %v3964_v53  ;;  %v4060_v52 = vld [vmem:[%s4869_s29 + $0x384] ss:$16 sps:$4 sm:$0xff]   ;;  %v4063_v53 = vld [vmem:[%s4869_s29 + $0x38c] ss:$16 sps:$4 sm:$0xff]  }
  0xb2   : > { %2688 = vmatprep.subr.bf16.mxu0 %v3965_v54  ;;  %2946 = vmatprep.subr.bf16.mxu1 %v3967_v55  ;;  %v4058_v54 = vld [vmem:[%s4869_s29 + $0x380] ss:$16 sps:$4 sm:$0xff]   ;;  %v4061_v55 = vld [vmem:[%s4869_s29 + $0x388] ss:$16 sps:$4 sm:$0xff]  }
  0xb5   : > { %2689 = vmatpush1.bf16.msra.mxu0 %v3969_v56  ;;  %2947 = vmatpush1.bf16.msra.mxu1 %v3970_v57  ;;  %v4066_v56 = vld [vmem:[%s4869_s29 + $0x3a4] ss:$16 sps:$4 sm:$0xff]   ;;  %v4069_v57 = vld [vmem:[%s4869_s29 + $0x3ac] ss:$16 sps:$4 sm:$0xff]  }
  0xb6   : > { %2690 = vmatprep.subr.bf16.mxu0 %v3971_v58  ;;  %2948 = vmatprep.subr.bf16.mxu1 %v3973_v59  ;;  %v4064_v58 = vld [vmem:[%s4869_s29 + $0x3a0] ss:$16 sps:$4 sm:$0xff]   ;;  %v4067_v59 = vld [vmem:[%s4869_s29 + $0x3a8] ss:$16 sps:$4 sm:$0xff]  }
  0xb9   : > { %2691 = vmatpush1.bf16.msra.mxu0 %v3975_v60  ;;  %2949 = vmatpush1.bf16.msra.mxu1 %v3976_v61  ;;  %v4072_v60 = vld [vmem:[%s4869_s29 + $0x3c4] ss:$16 sps:$4 sm:$0xff]   ;;  %v4075_v61 = vld [vmem:[%s4869_s29 + $0x3cc] ss:$16 sps:$4 sm:$0xff]  }
  0xba   : > { %2692 = vmatprep.subr.bf16.mxu0 %v3977_v62  ;;  %2950 = vmatprep.subr.bf16.mxu1 %v3979_v63  ;;  %v4070_v62 = vld [vmem:[%s4869_s29 + $0x3c0] ss:$16 sps:$4 sm:$0xff]   ;;  %v4073_v63 = vld [vmem:[%s4869_s29 + $0x3c8] ss:$16 sps:$4 sm:$0xff]  }
  0xbd   : > { %2693 = vmatpush1.bf16.msra.mxu0 %v3981_v0  ;;  %2951 = vmatpush1.bf16.msra.mxu1 %v3982_v1  ;;  %v4078_v0 = vld [vmem:[%s4869_s29 + $0x3e4] ss:$16 sps:$4 sm:$0xff]   ;;  %v4081_v1 = vld [vmem:[%s4869_s29 + $0x3ec] ss:$16 sps:$4 sm:$0xff]  }
  0xbe   : > { %2705 = vmatprep.subr.bf16.mxu0 %v3988_v2  ;;  %2963 = vmatprep.subr.bf16.mxu1 %v3991_v3  ;;  %v4076_v2 = vld [vmem:[%s4869_s29 + $0x3e0] ss:$16 sps:$4 sm:$0xff]   ;;  %v4079_v3 = vld [vmem:[%s4869_s29 + $0x3e8] ss:$16 sps:$4 sm:$0xff]  }
  0xc0   : > { %2695 = vmatmul.mubr.bf16.vlgmr.msra.gmra.mrb[0].mxu0 %v3983_v4  ;;  %2953 = vmatmul.mubr.bf16.vlgmr.msra.gmra.mrb[0].mxu1 %v3983_v4  ;;  %v4087_v4 = vld [vmem:[%s4869_s29 + $0x404] ss:$16 sps:$4 sm:$0xff]  }
  0xc1   : > { %2706 = vmatpush1.bf16.msra.mxu0 %v3986_v5  ;;  %2964 = vmatpush1.bf16.msra.mxu1 %v3989_v6  ;;  %v4090_v5 = vld [vmem:[%s4869_s29 + $0x40c] ss:$16 sps:$4 sm:$0xff]   ;;  %v4082_v6 = vld [vmem:[%s4862_s12 + $0x8] ss:$48 sps:$4 sm:$0xff]  }
  0xc2   : > { %2707 = vmatprep.subr.bf16.mxu0 %v3994_v7  ;;  %2965 = vmatprep.subr.bf16.mxu1 %v3997_v8  ;;  %v4085_v7 = vld [vmem:[%s4869_s29 + $0x400] ss:$16 sps:$4 sm:$0xff]   ;;  %v4088_v8 = vld [vmem:[%s4869_s29 + $0x408] ss:$16 sps:$4 sm:$0xff]  }
  0xc3   : > { %2737 = vmatprep.mubr.bf16.mxu0 %v4084_v31  ;;  %2995 = vmatprep.mubr.bf16.mxu1 %v4084_v31  ;;  %v4126_v31 = vld [vmem:[%s4869_s29 + $0x4cc] ss:$16 sps:$4 sm:$0xff]  }
  0xc5   : > { %2708 = vmatpush1.bf16.msra.mxu0 %v3992_v9  ;;  %2966 = vmatpush1.bf16.msra.mxu1 %v3995_v10  ;;  %v4093_v9 = vld [vmem:[%s4869_s29 + $0x424] ss:$16 sps:$4 sm:$0xff]   ;;  %v4096_v10 = vld [vmem:[%s4869_s29 + $0x42c] ss:$16 sps:$4 sm:$0xff]  }
  0xc6   : > { %2709 = vmatprep.subr.bf16.mxu0 %v4000_v11  ;;  %2967 = vmatprep.subr.bf16.mxu1 %v4003_v12  ;;  %v4091_v11 = vld [vmem:[%s4869_s29 + $0x420] ss:$16 sps:$4 sm:$0xff]   ;;  %v4094_v12 = vld [vmem:[%s4869_s29 + $0x428] ss:$16 sps:$4 sm:$0xff]  }
  0xc9   : > { %2710 = vmatpush1.bf16.msra.mxu0 %v3998_v13  ;;  %2968 = vmatpush1.bf16.msra.mxu1 %v4001_v14  ;;  %v4183_v13 = vld [vmem:[%s4862_s12 + $0x14] ss:$48 sps:$4 sm:$0xff]  }
  0xca   : > { %2711 = vmatprep.subr.bf16.mxu0 %v4006_v15  ;;  %2969 = vmatprep.subr.bf16.mxu1 %v4009_v16  ;;  %v4099_v14 = vld [vmem:[%s4869_s29 + $0x444] ss:$16 sps:$4 sm:$0xff]   ;;  %v4102_v15 = vld [vmem:[%s4869_s29 + $0x44c] ss:$16 sps:$4 sm:$0xff]   ;;  %v4097_v16 = vld [vmem:[%s4869_s29 + $0x440] ss:$16 sps:$4 sm:$0xff]  }
  0xcd   : > { %2712 = vmatpush1.bf16.msra.mxu0 %v4004_v17  ;;  %2970 = vmatpush1.bf16.msra.mxu1 %v4007_v18  ;;  %v4100_v17 = vld [vmem:[%s4869_s29 + $0x448] ss:$16 sps:$4 sm:$0xff]   ;;  %v4105_v18 = vld [vmem:[%s4869_s29 + $0x464] ss:$16 sps:$4 sm:$0xff]  }
  0xce   : > { %2713 = vmatprep.subr.bf16.mxu0 %v4012_v19  ;;  %2971 = vmatprep.subr.bf16.mxu1 %v4015_v20  ;;  %v4108_v19 = vld [vmem:[%s4869_s29 + $0x46c] ss:$16 sps:$4 sm:$0xff]   ;;  %v4103_v20 = vld [vmem:[%s4869_s29 + $0x460] ss:$16 sps:$4 sm:$0xff]  }
  0xd1   : > { %2714 = vmatpush1.bf16.msra.mxu0 %v4010_v21  ;;  %2972 = vmatpush1.bf16.msra.mxu1 %v4013_v22  ;;  %v4106_v21 = vld [vmem:[%s4869_s29 + $0x468] ss:$16 sps:$4 sm:$0xff]   ;;  %v4111_v22 = vld [vmem:[%s4869_s29 + $0x484] ss:$16 sps:$4 sm:$0xff]  }
  0xd2   : > { %2715 = vmatprep.subr.bf16.mxu0 %v4018_v23  ;;  %2973 = vmatprep.subr.bf16.mxu1 %v4021_v24  ;;  %v4114_v23 = vld [vmem:[%s4869_s29 + $0x48c] ss:$16 sps:$4 sm:$0xff]   ;;  %v4109_v24 = vld [vmem:[%s4869_s29 + $0x480] ss:$16 sps:$4 sm:$0xff]  }
  0xd5   : > { %2716 = vmatpush1.bf16.msra.mxu0 %v4016_v25  ;;  %2974 = vmatpush1.bf16.msra.mxu1 %v4019_v26  ;;  %v4112_v25 = vld [vmem:[%s4869_s29 + $0x488] ss:$16 sps:$4 sm:$0xff]   ;;  %v4117_v26 = vld [vmem:[%s4869_s29 + $0x4a4] ss:$16 sps:$4 sm:$0xff]  }
  0xd6   : > { %2717 = vmatprep.subr.bf16.mxu0 %v4024_v27  ;;  %2975 = vmatprep.subr.bf16.mxu1 %v4027_v28  ;;  %v4120_v27 = vld [vmem:[%s4869_s29 + $0x4ac] ss:$16 sps:$4 sm:$0xff]   ;;  %v4115_v28 = vld [vmem:[%s4869_s29 + $0x4a0] ss:$16 sps:$4 sm:$0xff]  }
  0xd9   : > { %2718 = vmatpush1.bf16.msra.mxu0 %v4022_v29  ;;  %2976 = vmatpush1.bf16.msra.mxu1 %v4025_v30  ;;  %v4118_v29 = vld [vmem:[%s4869_s29 + $0x4a8] ss:$16 sps:$4 sm:$0xff]   ;;  %v4123_v30 = vld [vmem:[%s4869_s29 + $0x4c4] ss:$16 sps:$4 sm:$0xff]  }
  0xda   : > { %2719 = vmatprep.subr.bf16.mxu0 %v4030_v32  ;;  %2977 = vmatprep.subr.bf16.mxu1 %v4033_v33  ;;  %v4121_v32 = vld [vmem:[%s4869_s29 + $0x4c0] ss:$16 sps:$4 sm:$0xff]   ;;  %v4124_v33 = vld [vmem:[%s4869_s29 + $0x4c8] ss:$16 sps:$4 sm:$0xff]  }
  0xdd   : > { %2720 = vmatpush1.bf16.msra.mxu0 %v4028_v34  ;;  %2978 = vmatpush1.bf16.msra.mxu1 %v4031_v35  ;;  %v4129_v34 = vld [vmem:[%s4869_s29 + $0x4e4] ss:$16 sps:$4 sm:$0xff]   ;;  %v4132_v35 = vld [vmem:[%s4869_s29 + $0x4ec] ss:$16 sps:$4 sm:$0xff]  }
  0xde   : > { %2721 = vmatprep.subr.bf16.mxu0 %v4036_v36  ;;  %2979 = vmatprep.subr.bf16.mxu1 %v4039_v37  ;;  %v4127_v36 = vld [vmem:[%s4869_s29 + $0x4e0] ss:$16 sps:$4 sm:$0xff]   ;;  %v4130_v37 = vld [vmem:[%s4869_s29 + $0x4e8] ss:$16 sps:$4 sm:$0xff]  }
  0xe1   : > { %2722 = vmatpush1.bf16.msra.mxu0 %v4034_v38  ;;  %2980 = vmatpush1.bf16.msra.mxu1 %v4037_v39  ;;  %v4135_v38 = vld [vmem:[%s4869_s29 + $0x504] ss:$16 sps:$4 sm:$0xff]   ;;  %v4138_v39 = vld [vmem:[%s4869_s29 + $0x50c] ss:$16 sps:$4 sm:$0xff]  }
  0xe2   : > { %2723 = vmatprep.subr.bf16.mxu0 %v4042_v40  ;;  %2981 = vmatprep.subr.bf16.mxu1 %v4045_v41  ;;  %v4133_v40 = vld [vmem:[%s4869_s29 + $0x500] ss:$16 sps:$4 sm:$0xff]   ;;  %v4136_v41 = vld [vmem:[%s4869_s29 + $0x508] ss:$16 sps:$4 sm:$0xff]  }
  0xe5   : > { %2724 = vmatpush1.bf16.msra.mxu0 %v4040_v42  ;;  %2982 = vmatpush1.bf16.msra.mxu1 %v4043_v43  ;;  %v4141_v42 = vld [vmem:[%s4869_s29 + $0x524] ss:$16 sps:$4 sm:$0xff]   ;;  %v4144_v43 = vld [vmem:[%s4869_s29 + $0x52c] ss:$16 sps:$4 sm:$0xff]  }
  0xe6   : > { %2725 = vmatprep.subr.bf16.mxu0 %v4048_v44  ;;  %2983 = vmatprep.subr.bf16.mxu1 %v4051_v45  ;;  %v4139_v44 = vld [vmem:[%s4869_s29 + $0x520] ss:$16 sps:$4 sm:$0xff]   ;;  %v4142_v45 = vld [vmem:[%s4869_s29 + $0x528] ss:$16 sps:$4 sm:$0xff]  }
  0xe9   : > { %2726 = vmatpush1.bf16.msra.mxu0 %v4046_v46  ;;  %2984 = vmatpush1.bf16.msra.mxu1 %v4049_v47  ;;  %v4147_v46 = vld [vmem:[%s4869_s29 + $0x544] ss:$16 sps:$4 sm:$0xff]   ;;  %v4150_v47 = vld [vmem:[%s4869_s29 + $0x54c] ss:$16 sps:$4 sm:$0xff]  }
  0xea   : > { %2727 = vmatprep.subr.bf16.mxu0 %v4054_v48  ;;  %2985 = vmatprep.subr.bf16.mxu1 %v4057_v49  ;;  %v4145_v48 = vld [vmem:[%s4869_s29 + $0x540] ss:$16 sps:$4 sm:$0xff]   ;;  %v4148_v49 = vld [vmem:[%s4869_s29 + $0x548] ss:$16 sps:$4 sm:$0xff]  }
  0xed   : > { %2728 = vmatpush1.bf16.msra.mxu0 %v4052_v50  ;;  %2986 = vmatpush1.bf16.msra.mxu1 %v4055_v51  ;;  %v4153_v50 = vld [vmem:[%s4869_s29 + $0x564] ss:$16 sps:$4 sm:$0xff]   ;;  %v4156_v51 = vld [vmem:[%s4869_s29 + $0x56c] ss:$16 sps:$4 sm:$0xff]  }
  0xee   : > { %2729 = vmatprep.subr.bf16.mxu0 %v4060_v52  ;;  %2987 = vmatprep.subr.bf16.mxu1 %v4063_v53  ;;  %v4151_v52 = vld [vmem:[%s4869_s29 + $0x560] ss:$16 sps:$4 sm:$0xff]   ;;  %v4154_v53 = vld [vmem:[%s4869_s29 + $0x568] ss:$16 sps:$4 sm:$0xff]  }
  0xf1   : > { %2730 = vmatpush1.bf16.msra.mxu0 %v4058_v54  ;;  %2988 = vmatpush1.bf16.msra.mxu1 %v4061_v55  ;;  %v4159_v54 = vld [vmem:[%s4869_s29 + $0x584] ss:$16 sps:$4 sm:$0xff]   ;;  %v4162_v55 = vld [vmem:[%s4869_s29 + $0x58c] ss:$16 sps:$4 sm:$0xff]  }
  0xf2   : > { %2731 = vmatprep.subr.bf16.mxu0 %v4066_v56  ;;  %2989 = vmatprep.subr.bf16.mxu1 %v4069_v57  ;;  %v4157_v56 = vld [vmem:[%s4869_s29 + $0x580] ss:$16 sps:$4 sm:$0xff]   ;;  %v4160_v57 = vld [vmem:[%s4869_s29 + $0x588] ss:$16 sps:$4 sm:$0xff]  }
  0xf5   : > { %2732 = vmatpush1.bf16.msra.mxu0 %v4064_v58  ;;  %2990 = vmatpush1.bf16.msra.mxu1 %v4067_v59  ;;  %v4165_v58 = vld [vmem:[%s4869_s29 + $0x5a4] ss:$16 sps:$4 sm:$0xff]   ;;  %v4168_v59 = vld [vmem:[%s4869_s29 + $0x5ac] ss:$16 sps:$4 sm:$0xff]  }
  0xf6   : > { %2733 = vmatprep.subr.bf16.mxu0 %v4072_v60  ;;  %2991 = vmatprep.subr.bf16.mxu1 %v4075_v61  ;;  %v4163_v60 = vld [vmem:[%s4869_s29 + $0x5a0] ss:$16 sps:$4 sm:$0xff]   ;;  %v4166_v61 = vld [vmem:[%s4869_s29 + $0x5a8] ss:$16 sps:$4 sm:$0xff]  }
  0xf9   : > { %2734 = vmatpush1.bf16.msra.mxu0 %v4070_v62  ;;  %2992 = vmatpush1.bf16.msra.mxu1 %v4073_v63  ;;  %v4171_v62 = vld [vmem:[%s4869_s29 + $0x5c4] ss:$16 sps:$4 sm:$0xff]   ;;  %v4174_v63 = vld [vmem:[%s4869_s29 + $0x5cc] ss:$16 sps:$4 sm:$0xff]  }
  0xfa   : > { %2735 = vmatprep.subr.bf16.mxu0 %v4078_v0  ;;  %2993 = vmatprep.subr.bf16.mxu1 %v4081_v1  ;;  %v4169_v0 = vld [vmem:[%s4869_s29 + $0x5c0] ss:$16 sps:$4 sm:$0xff]   ;;  %v4172_v1 = vld [vmem:[%s4869_s29 + $0x5c8] ss:$16 sps:$4 sm:$0xff]  }
  0xfd   : > { %2736 = vmatpush1.bf16.msra.mxu0 %v4076_v2  ;;  %2994 = vmatpush1.bf16.msra.mxu1 %v4079_v3  ;;  %v4177_v2 = vld [vmem:[%s4869_s29 + $0x5e4] ss:$16 sps:$4 sm:$0xff]   ;;  %v4180_v3 = vld [vmem:[%s4869_s29 + $0x5ec] ss:$16 sps:$4 sm:$0xff]  }
  0xfe   : > { %2748 = vmatprep.subr.bf16.mxu0 %v4087_v4  ;;  %3006 = vmatprep.subr.bf16.mxu1 %v4090_v5  ;;  %v4175_v4 = vld [vmem:[%s4869_s29 + $0x5e0] ss:$16 sps:$4 sm:$0xff]   ;;  %v4178_v5 = vld [vmem:[%s4869_s29 + $0x5e8] ss:$16 sps:$4 sm:$0xff]  }
 0x100   : > { %2738 = vmatmul.mubr.bf16.vlgmr.msra.gmra.mrb[0].mxu0 %v4082_v6  ;;  %2996 = vmatmul.mubr.bf16.vlgmr.msra.gmra.mrb[0].mxu1 %v4082_v6  ;;  %v4186_v6 = vld [vmem:[%s4869_s29 + $0x604] ss:$16 sps:$4 sm:$0xff]  }
 0x101   : > { %2749 = vmatpush1.bf16.msra.mxu0 %v4085_v7  ;;  %3007 = vmatpush1.bf16.msra.mxu1 %v4088_v8  ;;  %v4189_v7 = vld [vmem:[%s4869_s29 + $0x60c] ss:$16 sps:$4 sm:$0xff]   ;;  %v4181_v8 = vld [vmem:[%s4862_s12 + $0x10] ss:$48 sps:$4 sm:$0xff]  }
 0x102   : > { %2750 = vmatprep.subr.bf16.mxu0 %v4093_v9  ;;  %3008 = vmatprep.subr.bf16.mxu1 %v4096_v10  ;;  %v4184_v9 = vld [vmem:[%s4869_s29 + $0x600] ss:$16 sps:$4 sm:$0xff]   ;;  %v4187_v10 = vld [vmem:[%s4869_s29 + $0x608] ss:$16 sps:$4 sm:$0xff]  }
 0x103   : > { %2780 = vmatprep.mubr.bf16.mxu0 %v4183_v13  ;;  %3038 = vmatprep.mubr.bf16.mxu1 %v4183_v13  ;;  %v4282_v13 = vld [vmem:[%s4862_s12 + $0x1c] ss:$48 sps:$4 sm:$0xff]  }
 0x105   : > { %2751 = vmatpush1.bf16.msra.mxu0 %v4091_v11  ;;  %3009 = vmatpush1.bf16.msra.mxu1 %v4094_v12  ;;  %v4192_v11 = vld [vmem:[%s4869_s29 + $0x624] ss:$16 sps:$4 sm:$0xff]   ;;  %v4195_v12 = vld [vmem:[%s4869_s29 + $0x62c] ss:$16 sps:$4 sm:$0xff]  }
 0x106   : > { %2752 = vmatprep.subr.bf16.mxu0 %v4099_v14  ;;  %3010 = vmatprep.subr.bf16.mxu1 %v4102_v15  ;;  %v4190_v14 = vld [vmem:[%s4869_s29 + $0x620] ss:$16 sps:$4 sm:$0xff]   ;;  %v4193_v15 = vld [vmem:[%s4869_s29 + $0x628] ss:$16 sps:$4 sm:$0xff]  }
 0x109   : > { %2753 = vmatpush1.bf16.msra.mxu0 %v4097_v16  ;;  %3011 = vmatpush1.bf16.msra.mxu1 %v4100_v17  ;;  %v4198_v16 = vld [vmem:[%s4869_s29 + $0x644] ss:$16 sps:$4 sm:$0xff]   ;;  %v4201_v17 = vld [vmem:[%s4869_s29 + $0x64c] ss:$16 sps:$4 sm:$0xff]  }
 0x10a   : > { %2754 = vmatprep.subr.bf16.mxu0 %v4105_v18  ;;  %3012 = vmatprep.subr.bf16.mxu1 %v4108_v19  ;;  %v4196_v18 = vld [vmem:[%s4869_s29 + $0x640] ss:$16 sps:$4 sm:$0xff]   ;;  %v4199_v19 = vld [vmem:[%s4869_s29 + $0x648] ss:$16 sps:$4 sm:$0xff]  }
 0x10d   : > { %2755 = vmatpush1.bf16.msra.mxu0 %v4103_v20  ;;  %3013 = vmatpush1.bf16.msra.mxu1 %v4106_v21  ;;  %v4204_v20 = vld [vmem:[%s4869_s29 + $0x664] ss:$16 sps:$4 sm:$0xff]   ;;  %v4207_v21 = vld [vmem:[%s4869_s29 + $0x66c] ss:$16 sps:$4 sm:$0xff]  }
 0x10e   : > { %2756 = vmatprep.subr.bf16.mxu0 %v4111_v22  ;;  %3014 = vmatprep.subr.bf16.mxu1 %v4114_v23  ;;  %v4202_v22 = vld [vmem:[%s4869_s29 + $0x660] ss:$16 sps:$4 sm:$0xff]   ;;  %v4205_v23 = vld [vmem:[%s4869_s29 + $0x668] ss:$16 sps:$4 sm:$0xff]  }
 0x111   : > { %2757 = vmatpush1.bf16.msra.mxu0 %v4109_v24  ;;  %3015 = vmatpush1.bf16.msra.mxu1 %v4112_v25  ;;  %v4210_v24 = vld [vmem:[%s4869_s29 + $0x684] ss:$16 sps:$4 sm:$0xff]   ;;  %v4213_v25 = vld [vmem:[%s4869_s29 + $0x68c] ss:$16 sps:$4 sm:$0xff]  }
 0x112   : > { %2758 = vmatprep.subr.bf16.mxu0 %v4117_v26  ;;  %3016 = vmatprep.subr.bf16.mxu1 %v4120_v27  ;;  %v4208_v26 = vld [vmem:[%s4869_s29 + $0x680] ss:$16 sps:$4 sm:$0xff]   ;;  %v4211_v27 = vld [vmem:[%s4869_s29 + $0x688] ss:$16 sps:$4 sm:$0xff]  }
 0x115   : > { %2759 = vmatpush1.bf16.msra.mxu0 %v4115_v28  ;;  %3017 = vmatpush1.bf16.msra.mxu1 %v4118_v29  ;;  %v4216_v28 = vld [vmem:[%s4869_s29 + $0x6a4] ss:$16 sps:$4 sm:$0xff]   ;;  %v4219_v29 = vld [vmem:[%s4869_s29 + $0x6ac] ss:$16 sps:$4 sm:$0xff]  }
 0x116   : > { %2760 = vmatprep.subr.bf16.mxu0 %v4123_v30  ;;  %3018 = vmatprep.subr.bf16.mxu1 %v4126_v31  ;;  %v4214_v30 = vld [vmem:[%s4869_s29 + $0x6a0] ss:$16 sps:$4 sm:$0xff]   ;;  %v4217_v31 = vld [vmem:[%s4869_s29 + $0x6a8] ss:$16 sps:$4 sm:$0xff]  }
 0x119   : > { %2761 = vmatpush1.bf16.msra.mxu0 %v4121_v32  ;;  %3019 = vmatpush1.bf16.msra.mxu1 %v4124_v33  ;;  %v4222_v32 = vld [vmem:[%s4869_s29 + $0x6c4] ss:$16 sps:$4 sm:$0xff]   ;;  %v4225_v33 = vld [vmem:[%s4869_s29 + $0x6cc] ss:$16 sps:$4 sm:$0xff]  }
 0x11a   : > { %2762 = vmatprep.subr.bf16.mxu0 %v4129_v34  ;;  %3020 = vmatprep.subr.bf16.mxu1 %v4132_v35  ;;  %v4220_v34 = vld [vmem:[%s4869_s29 + $0x6c0] ss:$16 sps:$4 sm:$0xff]   ;;  %v4223_v35 = vld [vmem:[%s4869_s29 + $0x6c8] ss:$16 sps:$4 sm:$0xff]  }
 0x11d   : > { %2763 = vmatpush1.bf16.msra.mxu0 %v4127_v36  ;;  %3021 = vmatpush1.bf16.msra.mxu1 %v4130_v37  ;;  %v4228_v36 = vld [vmem:[%s4869_s29 + $0x6e4] ss:$16 sps:$4 sm:$0xff]   ;;  %v4231_v37 = vld [vmem:[%s4869_s29 + $0x6ec] ss:$16 sps:$4 sm:$0xff]  }
 0x11e   : > { %2764 = vmatprep.subr.bf16.mxu0 %v4135_v38  ;;  %3022 = vmatprep.subr.bf16.mxu1 %v4138_v39  ;;  %v4226_v38 = vld [vmem:[%s4869_s29 + $0x6e0] ss:$16 sps:$4 sm:$0xff]   ;;  %v4229_v39 = vld [vmem:[%s4869_s29 + $0x6e8] ss:$16 sps:$4 sm:$0xff]  }
 0x121   : > { %2765 = vmatpush1.bf16.msra.mxu0 %v4133_v40  ;;  %3023 = vmatpush1.bf16.msra.mxu1 %v4136_v41  ;;  %v4234_v40 = vld [vmem:[%s4869_s29 + $0x704] ss:$16 sps:$4 sm:$0xff]   ;;  %v4237_v41 = vld [vmem:[%s4869_s29 + $0x70c] ss:$16 sps:$4 sm:$0xff]  }
 0x122   : > { %2766 = vmatprep.subr.bf16.mxu0 %v4141_v42  ;;  %3024 = vmatprep.subr.bf16.mxu1 %v4144_v43  ;;  %v4232_v42 = vld [vmem:[%s4869_s29 + $0x700] ss:$16 sps:$4 sm:$0xff]   ;;  %v4235_v43 = vld [vmem:[%s4869_s29 + $0x708] ss:$16 sps:$4 sm:$0xff]  }
 0x125   : > { %2767 = vmatpush1.bf16.msra.mxu0 %v4139_v44  ;;  %3025 = vmatpush1.bf16.msra.mxu1 %v4142_v45  ;;  %v4240_v44 = vld [vmem:[%s4869_s29 + $0x724] ss:$16 sps:$4 sm:$0xff]   ;;  %v4243_v45 = vld [vmem:[%s4869_s29 + $0x72c] ss:$16 sps:$4 sm:$0xff]  }
 0x126   : > { %2768 = vmatprep.subr.bf16.mxu0 %v4147_v46  ;;  %3026 = vmatprep.subr.bf16.mxu1 %v4150_v47  ;;  %v4238_v46 = vld [vmem:[%s4869_s29 + $0x720] ss:$16 sps:$4 sm:$0xff]   ;;  %v4241_v47 = vld [vmem:[%s4869_s29 + $0x728] ss:$16 sps:$4 sm:$0xff]  }
 0x129   : > { %2769 = vmatpush1.bf16.msra.mxu0 %v4145_v48  ;;  %3027 = vmatpush1.bf16.msra.mxu1 %v4148_v49  ;;  %v4246_v48 = vld [vmem:[%s4869_s29 + $0x744] ss:$16 sps:$4 sm:$0xff]   ;;  %v4249_v49 = vld [vmem:[%s4869_s29 + $0x74c] ss:$16 sps:$4 sm:$0xff]  }
 0x12a   : > { %2770 = vmatprep.subr.bf16.mxu0 %v4153_v50  ;;  %3028 = vmatprep.subr.bf16.mxu1 %v4156_v51  ;;  %v4244_v50 = vld [vmem:[%s4869_s29 + $0x740] ss:$16 sps:$4 sm:$0xff]   ;;  %v4247_v51 = vld [vmem:[%s4869_s29 + $0x748] ss:$16 sps:$4 sm:$0xff]  }
 0x12d   : > { %2771 = vmatpush1.bf16.msra.mxu0 %v4151_v52  ;;  %3029 = vmatpush1.bf16.msra.mxu1 %v4154_v53  ;;  %v4252_v52 = vld [vmem:[%s4869_s29 + $0x764] ss:$16 sps:$4 sm:$0xff]   ;;  %v4255_v53 = vld [vmem:[%s4869_s29 + $0x76c] ss:$16 sps:$4 sm:$0xff]  }
 0x12e   : > { %2772 = vmatprep.subr.bf16.mxu0 %v4159_v54  ;;  %3030 = vmatprep.subr.bf16.mxu1 %v4162_v55  ;;  %v4250_v54 = vld [vmem:[%s4869_s29 + $0x760] ss:$16 sps:$4 sm:$0xff]   ;;  %v4253_v55 = vld [vmem:[%s4869_s29 + $0x768] ss:$16 sps:$4 sm:$0xff]  }
 0x131   : > { %2773 = vmatpush1.bf16.msra.mxu0 %v4157_v56  ;;  %3031 = vmatpush1.bf16.msra.mxu1 %v4160_v57  ;;  %v4258_v56 = vld [vmem:[%s4869_s29 + $0x784] ss:$16 sps:$4 sm:$0xff]   ;;  %v4261_v57 = vld [vmem:[%s4869_s29 + $0x78c] ss:$16 sps:$4 sm:$0xff]  }
 0x132   : > { %2774 = vmatprep.subr.bf16.mxu0 %v4165_v58  ;;  %3032 = vmatprep.subr.bf16.mxu1 %v4168_v59  ;;  %v4256_v58 = vld [vmem:[%s4869_s29 + $0x780] ss:$16 sps:$4 sm:$0xff]   ;;  %v4259_v59 = vld [vmem:[%s4869_s29 + $0x788] ss:$16 sps:$4 sm:$0xff]  }
 0x135   : > { %2775 = vmatpush1.bf16.msra.mxu0 %v4163_v60  ;;  %3033 = vmatpush1.bf16.msra.mxu1 %v4166_v61  ;;  %v4264_v60 = vld [vmem:[%s4869_s29 + $0x7a4] ss:$16 sps:$4 sm:$0xff]   ;;  %v4267_v61 = vld [vmem:[%s4869_s29 + $0x7ac] ss:$16 sps:$4 sm:$0xff]  }
 0x136   : > { %2776 = vmatprep.subr.bf16.mxu0 %v4171_v62  ;;  %3034 = vmatprep.subr.bf16.mxu1 %v4174_v63  ;;  %v4262_v62 = vld [vmem:[%s4869_s29 + $0x7a0] ss:$16 sps:$4 sm:$0xff]   ;;  %v4265_v63 = vld [vmem:[%s4869_s29 + $0x7a8] ss:$16 sps:$4 sm:$0xff]  }
 0x139   : > { %2777 = vmatpush1.bf16.msra.mxu0 %v4169_v0  ;;  %3035 = vmatpush1.bf16.msra.mxu1 %v4172_v1  ;;  %v4270_v0 = vld [vmem:[%s4869_s29 + $0x7c4] ss:$16 sps:$4 sm:$0xff]   ;;  %v4273_v1 = vld [vmem:[%s4869_s29 + $0x7cc] ss:$16 sps:$4 sm:$0xff]  }
 0x13a   : > { %2778 = vmatprep.subr.bf16.mxu0 %v4177_v2  ;;  %3036 = vmatprep.subr.bf16.mxu1 %v4180_v3  ;;  %v4268_v2 = vld [vmem:[%s4869_s29 + $0x7c0] ss:$16 sps:$4 sm:$0xff]   ;;  %v4271_v3 = vld [vmem:[%s4869_s29 + $0x7c8] ss:$16 sps:$4 sm:$0xff]  }
 0x13d   : > { %2779 = vmatpush1.bf16.msra.mxu0 %v4175_v4  ;;  %3037 = vmatpush1.bf16.msra.mxu1 %v4178_v5  ;;  %v4276_v4 = vld [vmem:[%s4869_s29 + $0x7e4] ss:$16 sps:$4 sm:$0xff]   ;;  %v4279_v5 = vld [vmem:[%s4869_s29 + $0x7ec] ss:$16 sps:$4 sm:$0xff]  }
 0x13e   : > { %2791 = vmatprep.subr.bf16.mxu0 %v4186_v6  ;;  %3049 = vmatprep.subr.bf16.mxu1 %v4189_v7  ;;  %v4274_v6 = vld [vmem:[%s4869_s29 + $0x7e0] ss:$16 sps:$4 sm:$0xff]   ;;  %v4277_v7 = vld [vmem:[%s4869_s29 + $0x7e8] ss:$16 sps:$4 sm:$0xff]  }
 0x140   : > { %2781 = vmatmul.mubr.bf16.vlgmr.msra.gmra.mrb[0].mxu0 %v4181_v8  ;;  %3039 = vmatmul.mubr.bf16.vlgmr.msra.gmra.mrb[0].mxu1 %v4181_v8  ;;  %v4285_v8 = vld [vmem:[%s4869_s29 + $0x804] ss:$16 sps:$4 sm:$0xff]  }
 0x141   : > { %2792 = vmatpush1.bf16.msra.mxu0 %v4184_v9  ;;  %3050 = vmatpush1.bf16.msra.mxu1 %v4187_v10  ;;  %v4288_v9 = vld [vmem:[%s4869_s29 + $0x80c] ss:$16 sps:$4 sm:$0xff]   ;;  %v4280_v10 = vld [vmem:[%s4862_s12 + $0x18] ss:$48 sps:$4 sm:$0xff]  }
 0x142   : > { %2793 = vmatprep.subr.bf16.mxu0 %v4192_v11  ;;  %3051 = vmatprep.subr.bf16.mxu1 %v4195_v12  ;;  %v4283_v11 = vld [vmem:[%s4869_s29 + $0x800] ss:$16 sps:$4 sm:$0xff]   ;;  %v4286_v12 = vld [vmem:[%s4869_s29 + $0x808] ss:$16 sps:$4 sm:$0xff]  }
 0x143   : > { %2823 = vmatprep.mubr.bf16.mxu0 %v4282_v13  ;;  %3081 = vmatprep.mubr.bf16.mxu1 %v4282_v13  ;;  %v4291_v13 = vld [vmem:[%s4869_s29 + $0x824] ss:$16 sps:$4 sm:$0xff]  }
 0x145   : > { %2794 = vmatpush1.bf16.msra.mxu0 %v4190_v14  ;;  %3052 = vmatpush1.bf16.msra.mxu1 %v4193_v15  ;;  %v4294_v14 = vld [vmem:[%s4869_s29 + $0x82c] ss:$16 sps:$4 sm:$0xff]   ;;  %v4381_v15 = vld [vmem:[%s4862_s12 + $0x24] ss:$48 sps:$4 sm:$0xff]  }
 0x146   : > { %2795 = vmatprep.subr.bf16.mxu0 %v4198_v16  ;;  %3053 = vmatprep.subr.bf16.mxu1 %v4201_v17  ;;  %v4289_v16 = vld [vmem:[%s4869_s29 + $0x820] ss:$16 sps:$4 sm:$0xff]   ;;  %v4292_v17 = vld [vmem:[%s4869_s29 + $0x828] ss:$16 sps:$4 sm:$0xff]  }
 0x149   : > { %2796 = vmatpush1.bf16.msra.mxu0 %v4196_v18  ;;  %3054 = vmatpush1.bf16.msra.mxu1 %v4199_v19  ;;  %v4297_v18 = vld [vmem:[%s4869_s29 + $0x844] ss:$16 sps:$4 sm:$0xff]   ;;  %v4300_v19 = vld [vmem:[%s4869_s29 + $0x84c] ss:$16 sps:$4 sm:$0xff]  }
 0x14a   : > { %2797 = vmatprep.subr.bf16.mxu0 %v4204_v20  ;;  %3055 = vmatprep.subr.bf16.mxu1 %v4207_v21  ;;  %v4295_v20 = vld [vmem:[%s4869_s29 + $0x840] ss:$16 sps:$4 sm:$0xff]   ;;  %v4298_v21 = vld [vmem:[%s4869_s29 + $0x848] ss:$16 sps:$4 sm:$0xff]  }
 0x14d   : > { %2798 = vmatpush1.bf16.msra.mxu0 %v4202_v22  ;;  %3056 = vmatpush1.bf16.msra.mxu1 %v4205_v23  ;;  %v4303_v22 = vld [vmem:[%s4869_s29 + $0x864] ss:$16 sps:$4 sm:$0xff]   ;;  %v4306_v23 = vld [vmem:[%s4869_s29 + $0x86c] ss:$16 sps:$4 sm:$0xff]  }
 0x14e   : > { %2799 = vmatprep.subr.bf16.mxu0 %v4210_v24  ;;  %3057 = vmatprep.subr.bf16.mxu1 %v4213_v25  ;;  %v4301_v24 = vld [vmem:[%s4869_s29 + $0x860] ss:$16 sps:$4 sm:$0xff]   ;;  %v4304_v25 = vld [vmem:[%s4869_s29 + $0x868] ss:$16 sps:$4 sm:$0xff]  }
 0x151   : > { %2800 = vmatpush1.bf16.msra.mxu0 %v4208_v26  ;;  %3058 = vmatpush1.bf16.msra.mxu1 %v4211_v27  ;;  %v4309_v26 = vld [vmem:[%s4869_s29 + $0x884] ss:$16 sps:$4 sm:$0xff]   ;;  %v4312_v27 = vld [vmem:[%s4869_s29 + $0x88c] ss:$16 sps:$4 sm:$0xff]  }
 0x152   : > { %2801 = vmatprep.subr.bf16.mxu0 %v4216_v28  ;;  %3059 = vmatprep.subr.bf16.mxu1 %v4219_v29  ;;  %v4307_v28 = vld [vmem:[%s4869_s29 + $0x880] ss:$16 sps:$4 sm:$0xff]   ;;  %v4310_v29 = vld [vmem:[%s4869_s29 + $0x888] ss:$16 sps:$4 sm:$0xff]  }
 0x155   : > { %2802 = vmatpush1.bf16.msra.mxu0 %v4214_v30  ;;  %3060 = vmatpush1.bf16.msra.mxu1 %v4217_v31  ;;  %v4315_v30 = vld [vmem:[%s4869_s29 + $0x8a4] ss:$16 sps:$4 sm:$0xff]   ;;  %v4318_v31 = vld [vmem:[%s4869_s29 + $0x8ac] ss:$16 sps:$4 sm:$0xff]  }
 0x156   : > { %2803 = vmatprep.subr.bf16.mxu0 %v4222_v32  ;;  %3061 = vmatprep.subr.bf16.mxu1 %v4225_v33  ;;  %v4313_v32 = vld [vmem:[%s4869_s29 + $0x8a0] ss:$16 sps:$4 sm:$0xff]   ;;  %v4316_v33 = vld [vmem:[%s4869_s29 + $0x8a8] ss:$16 sps:$4 sm:$0xff]  }
 0x159   : > { %2804 = vmatpush1.bf16.msra.mxu0 %v4220_v34  ;;  %3062 = vmatpush1.bf16.msra.mxu1 %v4223_v35  ;;  %v4321_v34 = vld [vmem:[%s4869_s29 + $0x8c4] ss:$16 sps:$4 sm:$0xff]   ;;  %v4324_v35 = vld [vmem:[%s4869_s29 + $0x8cc] ss:$16 sps:$4 sm:$0xff]  }
 0x15a   : > { %2805 = vmatprep.subr.bf16.mxu0 %v4228_v36  ;;  %3063 = vmatprep.subr.bf16.mxu1 %v4231_v37  ;;  %v4319_v36 = vld [vmem:[%s4869_s29 + $0x8c0] ss:$16 sps:$4 sm:$0xff]   ;;  %v4322_v37 = vld [vmem:[%s4869_s29 + $0x8c8] ss:$16 sps:$4 sm:$0xff]  }
 0x15d   : > { %2806 = vmatpush1.bf16.msra.mxu0 %v4226_v38  ;;  %3064 = vmatpush1.bf16.msra.mxu1 %v4229_v39  ;;  %v4327_v38 = vld [vmem:[%s4869_s29 + $0x8e4] ss:$16 sps:$4 sm:$0xff]   ;;  %v4330_v39 = vld [vmem:[%s4869_s29 + $0x8ec] ss:$16 sps:$4 sm:$0xff]  }
 0x15e   : > { %2807 = vmatprep.subr.bf16.mxu0 %v4234_v40  ;;  %3065 = vmatprep.subr.bf16.mxu1 %v4237_v41  ;;  %v4325_v40 = vld [vmem:[%s4869_s29 + $0x8e0] ss:$16 sps:$4 sm:$0xff]   ;;  %v4328_v41 = vld [vmem:[%s4869_s29 + $0x8e8] ss:$16 sps:$4 sm:$0xff]  }
 0x161   : > { %2808 = vmatpush1.bf16.msra.mxu0 %v4232_v42  ;;  %3066 = vmatpush1.bf16.msra.mxu1 %v4235_v43  ;;  %v4333_v42 = vld [vmem:[%s4869_s29 + $0x904] ss:$16 sps:$4 sm:$0xff]   ;;  %v4336_v43 = vld [vmem:[%s4869_s29 + $0x90c] ss:$16 sps:$4 sm:$0xff]  }
 0x162   : > { %2809 = vmatprep.subr.bf16.mxu0 %v4240_v44  ;;  %3067 = vmatprep.subr.bf16.mxu1 %v4243_v45  ;;  %v4331_v44 = vld [vmem:[%s4869_s29 + $0x900] ss:$16 sps:$4 sm:$0xff]   ;;  %v4334_v45 = vld [vmem:[%s4869_s29 + $0x908] ss:$16 sps:$4 sm:$0xff]  }
 0x165   : > { %2810 = vmatpush1.bf16.msra.mxu0 %v4238_v46  ;;  %3068 = vmatpush1.bf16.msra.mxu1 %v4241_v47  ;;  %v4339_v46 = vld [vmem:[%s4869_s29 + $0x924] ss:$16 sps:$4 sm:$0xff]   ;;  %v4342_v47 = vld [vmem:[%s4869_s29 + $0x92c] ss:$16 sps:$4 sm:$0xff]  }
 0x166   : > { %2811 = vmatprep.subr.bf16.mxu0 %v4246_v48  ;;  %3069 = vmatprep.subr.bf16.mxu1 %v4249_v49  ;;  %v4337_v48 = vld [vmem:[%s4869_s29 + $0x920] ss:$16 sps:$4 sm:$0xff]   ;;  %v4340_v49 = vld [vmem:[%s4869_s29 + $0x928] ss:$16 sps:$4 sm:$0xff]  }
 0x169   : > { %2812 = vmatpush1.bf16.msra.mxu0 %v4244_v50  ;;  %3070 = vmatpush1.bf16.msra.mxu1 %v4247_v51  ;;  %v4345_v50 = vld [vmem:[%s4869_s29 + $0x944] ss:$16 sps:$4 sm:$0xff]   ;;  %v4348_v51 = vld [vmem:[%s4869_s29 + $0x94c] ss:$16 sps:$4 sm:$0xff]  }
 0x16a   : > { %2813 = vmatprep.subr.bf16.mxu0 %v4252_v52  ;;  %3071 = vmatprep.subr.bf16.mxu1 %v4255_v53  ;;  %v4343_v52 = vld [vmem:[%s4869_s29 + $0x940] ss:$16 sps:$4 sm:$0xff]   ;;  %v4346_v53 = vld [vmem:[%s4869_s29 + $0x948] ss:$16 sps:$4 sm:$0xff]  }
 0x16d   : > { %2814 = vmatpush1.bf16.msra.mxu0 %v4250_v54  ;;  %3072 = vmatpush1.bf16.msra.mxu1 %v4253_v55  ;;  %v4351_v54 = vld [vmem:[%s4869_s29 + $0x964] ss:$16 sps:$4 sm:$0xff]   ;;  %v4354_v55 = vld [vmem:[%s4869_s29 + $0x96c] ss:$16 sps:$4 sm:$0xff]  }
 0x16e   : > { %2815 = vmatprep.subr.bf16.mxu0 %v4258_v56  ;;  %3073 = vmatprep.subr.bf16.mxu1 %v4261_v57  ;;  %v4349_v56 = vld [vmem:[%s4869_s29 + $0x960] ss:$16 sps:$4 sm:$0xff]   ;;  %v4352_v57 = vld [vmem:[%s4869_s29 + $0x968] ss:$16 sps:$4 sm:$0xff]  }
 0x171   : > { %2816 = vmatpush1.bf16.msra.mxu0 %v4256_v58  ;;  %3074 = vmatpush1.bf16.msra.mxu1 %v4259_v59  ;;  %v4357_v58 = vld [vmem:[%s4869_s29 + $0x984] ss:$16 sps:$4 sm:$0xff]   ;;  %v4360_v59 = vld [vmem:[%s4869_s29 + $0x98c] ss:$16 sps:$4 sm:$0xff]  }
 0x172   : > { %2817 = vmatprep.subr.bf16.mxu0 %v4264_v60  ;;  %3075 = vmatprep.subr.bf16.mxu1 %v4267_v61  ;;  %v4355_v60 = vld [vmem:[%s4869_s29 + $0x980] ss:$16 sps:$4 sm:$0xff]   ;;  %v4358_v61 = vld [vmem:[%s4869_s29 + $0x988] ss:$16 sps:$4 sm:$0xff]  }
 0x175   : > { %2818 = vmatpush1.bf16.msra.mxu0 %v4262_v62  ;;  %3076 = vmatpush1.bf16.msra.mxu1 %v4265_v63  ;;  %v4363_v62 = vld [vmem:[%s4869_s29 + $0x9a4] ss:$16 sps:$4 sm:$0xff]   ;;  %v4366_v63 = vld [vmem:[%s4869_s29 + $0x9ac] ss:$16 sps:$4 sm:$0xff]  }
 0x176   : > { %2819 = vmatprep.subr.bf16.mxu0 %v4270_v0  ;;  %3077 = vmatprep.subr.bf16.mxu1 %v4273_v1  ;;  %v4361_v0 = vld [vmem:[%s4869_s29 + $0x9a0] ss:$16 sps:$4 sm:$0xff]   ;;  %v4364_v1 = vld [vmem:[%s4869_s29 + $0x9a8] ss:$16 sps:$4 sm:$0xff]  }
 0x179   : > { %2820 = vmatpush1.bf16.msra.mxu0 %v4268_v2  ;;  %3078 = vmatpush1.bf16.msra.mxu1 %v4271_v3  ;;  %v4369_v2 = vld [vmem:[%s4869_s29 + $0x9c4] ss:$16 sps:$4 sm:$0xff]   ;;  %v4372_v3 = vld [vmem:[%s4869_s29 + $0x9cc] ss:$16 sps:$4 sm:$0xff]  }
 0x17a   : > { %2821 = vmatprep.subr.bf16.mxu0 %v4276_v4  ;;  %3079 = vmatprep.subr.bf16.mxu1 %v4279_v5  ;;  %v4367_v4 = vld [vmem:[%s4869_s29 + $0x9c0] ss:$16 sps:$4 sm:$0xff]   ;;  %v4370_v5 = vld [vmem:[%s4869_s29 + $0x9c8] ss:$16 sps:$4 sm:$0xff]  }
 0x17d   : > { %2822 = vmatpush1.bf16.msra.mxu0 %v4274_v6  ;;  %3080 = vmatpush1.bf16.msra.mxu1 %v4277_v7  ;;  %v4375_v6 = vld [vmem:[%s4869_s29 + $0x9e4] ss:$16 sps:$4 sm:$0xff]   ;;  %v4378_v7 = vld [vmem:[%s4869_s29 + $0x9ec] ss:$16 sps:$4 sm:$0xff]  }
 0x17e   : > { %2834 = vmatprep.subr.bf16.mxu0 %v4285_v8  ;;  %3092 = vmatprep.subr.bf16.mxu1 %v4288_v9  ;;  %v4373_v8 = vld [vmem:[%s4869_s29 + $0x9e0] ss:$16 sps:$4 sm:$0xff]   ;;  %v4376_v9 = vld [vmem:[%s4869_s29 + $0x9e8] ss:$16 sps:$4 sm:$0xff]  }
 0x180   : > { %2824 = vmatmul.mubr.bf16.vlgmr.msra.gmra.mrb[0].mxu0 %v4280_v10  ;;  %3082 = vmatmul.mubr.bf16.vlgmr.msra.gmra.mrb[0].mxu1 %v4280_v10  ;;  %v4384_v10 = vld [vmem:[%s4869_s29 + $0xa04] ss:$16 sps:$4 sm:$0xff]  }
 0x181   : > { %2835 = vmatpush1.bf16.msra.mxu0 %v4283_v11  ;;  %3093 = vmatpush1.bf16.msra.mxu1 %v4286_v12  ;;  %v4387_v11 = vld [vmem:[%s4869_s29 + $0xa0c] ss:$16 sps:$4 sm:$0xff]   ;;  %v4379_v12 = vld [vmem:[%s4862_s12 + $0x20] ss:$48 sps:$4 sm:$0xff]  }
 0x182   : > { %2836 = vmatprep.subr.bf16.mxu0 %v4291_v13  ;;  %3094 = vmatprep.subr.bf16.mxu1 %v4294_v14  ;;  %v4382_v13 = vld [vmem:[%s4869_s29 + $0xa00] ss:$16 sps:$4 sm:$0xff]   ;;  %v4385_v14 = vld [vmem:[%s4869_s29 + $0xa08] ss:$16 sps:$4 sm:$0xff]  }
 0x183   : > { %2866 = vmatprep.mubr.bf16.mxu0 %v4381_v15  ;;  %3124 = vmatprep.mubr.bf16.mxu1 %v4381_v15  ;;  %v4390_v15 = vld [vmem:[%s4869_s29 + $0xa24] ss:$16 sps:$4 sm:$0xff]  }
 0x185   : > { %2837 = vmatpush1.bf16.msra.mxu0 %v4289_v16  ;;  %3095 = vmatpush1.bf16.msra.mxu1 %v4292_v17  ;;  %v4393_v16 = vld [vmem:[%s4869_s29 + $0xa2c] ss:$16 sps:$4 sm:$0xff]  }
 0x186   : > { %2838 = vmatprep.subr.bf16.mxu0 %v4297_v18  ;;  %3096 = vmatprep.subr.bf16.mxu1 %v4300_v19  ;;  %v4480_v17 = vld [vmem:[%s4862_s12 + $0x2c] ss:$48 sps:$4 sm:$0xff]   ;;  %v4388_v18 = vld [vmem:[%s4869_s29 + $0xa20] ss:$16 sps:$4 sm:$0xff]   ;;  %v4391_v19 = vld [vmem:[%s4869_s29 + $0xa28] ss:$16 sps:$4 sm:$0xff]  }
 0x189   : > { %2839 = vmatpush1.bf16.msra.mxu0 %v4295_v20  ;;  %3097 = vmatpush1.bf16.msra.mxu1 %v4298_v21  ;;  %v4396_v20 = vld [vmem:[%s4869_s29 + $0xa44] ss:$16 sps:$4 sm:$0xff]   ;;  %v4399_v21 = vld [vmem:[%s4869_s29 + $0xa4c] ss:$16 sps:$4 sm:$0xff]  }
 0x18a   : > { %2840 = vmatprep.subr.bf16.mxu0 %v4303_v22  ;;  %3098 = vmatprep.subr.bf16.mxu1 %v4306_v23  ;;  %v4394_v22 = vld [vmem:[%s4869_s29 + $0xa40] ss:$16 sps:$4 sm:$0xff]   ;;  %v4397_v23 = vld [vmem:[%s4869_s29 + $0xa48] ss:$16 sps:$4 sm:$0xff]  }
 0x18d   : > { %2841 = vmatpush1.bf16.msra.mxu0 %v4301_v24  ;;  %3099 = vmatpush1.bf16.msra.mxu1 %v4304_v25  ;;  %v4402_v24 = vld [vmem:[%s4869_s29 + $0xa64] ss:$16 sps:$4 sm:$0xff]   ;;  %v4405_v25 = vld [vmem:[%s4869_s29 + $0xa6c] ss:$16 sps:$4 sm:$0xff]  }
 0x18e   : > { %2842 = vmatprep.subr.bf16.mxu0 %v4309_v26  ;;  %3100 = vmatprep.subr.bf16.mxu1 %v4312_v27  ;;  %v4400_v26 = vld [vmem:[%s4869_s29 + $0xa60] ss:$16 sps:$4 sm:$0xff]   ;;  %v4403_v27 = vld [vmem:[%s4869_s29 + $0xa68] ss:$16 sps:$4 sm:$0xff]  }
 0x191   : > { %2843 = vmatpush1.bf16.msra.mxu0 %v4307_v28  ;;  %3101 = vmatpush1.bf16.msra.mxu1 %v4310_v29  ;;  %v4408_v28 = vld [vmem:[%s4869_s29 + $0xa84] ss:$16 sps:$4 sm:$0xff]   ;;  %v4411_v29 = vld [vmem:[%s4869_s29 + $0xa8c] ss:$16 sps:$4 sm:$0xff]  }
 0x192   : > { %2844 = vmatprep.subr.bf16.mxu0 %v4315_v30  ;;  %3102 = vmatprep.subr.bf16.mxu1 %v4318_v31  ;;  %v4406_v30 = vld [vmem:[%s4869_s29 + $0xa80] ss:$16 sps:$4 sm:$0xff]   ;;  %v4409_v31 = vld [vmem:[%s4869_s29 + $0xa88] ss:$16 sps:$4 sm:$0xff]  }
 0x195   : > { %2845 = vmatpush1.bf16.msra.mxu0 %v4313_v32  ;;  %3103 = vmatpush1.bf16.msra.mxu1 %v4316_v33  ;;  %v4414_v32 = vld [vmem:[%s4869_s29 + $0xaa4] ss:$16 sps:$4 sm:$0xff]   ;;  %v4417_v33 = vld [vmem:[%s4869_s29 + $0xaac] ss:$16 sps:$4 sm:$0xff]  }
 0x196   : > { %2846 = vmatprep.subr.bf16.mxu0 %v4321_v34  ;;  %3104 = vmatprep.subr.bf16.mxu1 %v4324_v35  ;;  %v4412_v34 = vld [vmem:[%s4869_s29 + $0xaa0] ss:$16 sps:$4 sm:$0xff]   ;;  %v4415_v35 = vld [vmem:[%s4869_s29 + $0xaa8] ss:$16 sps:$4 sm:$0xff]  }
 0x199   : > { %2847 = vmatpush1.bf16.msra.mxu0 %v4319_v36  ;;  %3105 = vmatpush1.bf16.msra.mxu1 %v4322_v37  ;;  %v4420_v36 = vld [vmem:[%s4869_s29 + $0xac4] ss:$16 sps:$4 sm:$0xff]   ;;  %v4423_v37 = vld [vmem:[%s4869_s29 + $0xacc] ss:$16 sps:$4 sm:$0xff]  }
 0x19a   : > { %2848 = vmatprep.subr.bf16.mxu0 %v4327_v38  ;;  %3106 = vmatprep.subr.bf16.mxu1 %v4330_v39  ;;  %v4418_v38 = vld [vmem:[%s4869_s29 + $0xac0] ss:$16 sps:$4 sm:$0xff]   ;;  %v4421_v39 = vld [vmem:[%s4869_s29 + $0xac8] ss:$16 sps:$4 sm:$0xff]  }
 0x19d   : > { %2849 = vmatpush1.bf16.msra.mxu0 %v4325_v40  ;;  %3107 = vmatpush1.bf16.msra.mxu1 %v4328_v41  ;;  %v4426_v40 = vld [vmem:[%s4869_s29 + $0xae4] ss:$16 sps:$4 sm:$0xff]   ;;  %v4429_v41 = vld [vmem:[%s4869_s29 + $0xaec] ss:$16 sps:$4 sm:$0xff]  }
 0x19e   : > { %2850 = vmatprep.subr.bf16.mxu0 %v4333_v42  ;;  %3108 = vmatprep.subr.bf16.mxu1 %v4336_v43  ;;  %v4424_v42 = vld [vmem:[%s4869_s29 + $0xae0] ss:$16 sps:$4 sm:$0xff]   ;;  %v4427_v43 = vld [vmem:[%s4869_s29 + $0xae8] ss:$16 sps:$4 sm:$0xff]  }
 0x1a1   : > { %2851 = vmatpush1.bf16.msra.mxu0 %v4331_v44  ;;  %3109 = vmatpush1.bf16.msra.mxu1 %v4334_v45  ;;  %v4432_v44 = vld [vmem:[%s4869_s29 + $0xb04] ss:$16 sps:$4 sm:$0xff]   ;;  %v4435_v45 = vld [vmem:[%s4869_s29 + $0xb0c] ss:$16 sps:$4 sm:$0xff]  }
 0x1a2   : > { %2852 = vmatprep.subr.bf16.mxu0 %v4339_v46  ;;  %3110 = vmatprep.subr.bf16.mxu1 %v4342_v47  ;;  %v4430_v46 = vld [vmem:[%s4869_s29 + $0xb00] ss:$16 sps:$4 sm:$0xff]   ;;  %v4433_v47 = vld [vmem:[%s4869_s29 + $0xb08] ss:$16 sps:$4 sm:$0xff]  }
 0x1a5   : > { %2853 = vmatpush1.bf16.msra.mxu0 %v4337_v48  ;;  %3111 = vmatpush1.bf16.msra.mxu1 %v4340_v49  ;;  %v4438_v48 = vld [vmem:[%s4869_s29 + $0xb24] ss:$16 sps:$4 sm:$0xff]   ;;  %v4441_v49 = vld [vmem:[%s4869_s29 + $0xb2c] ss:$16 sps:$4 sm:$0xff]  }
 0x1a6   : > { %2854 = vmatprep.subr.bf16.mxu0 %v4345_v50  ;;  %3112 = vmatprep.subr.bf16.mxu1 %v4348_v51  ;;  %v4436_v50 = vld [vmem:[%s4869_s29 + $0xb20] ss:$16 sps:$4 sm:$0xff]   ;;  %v4439_v51 = vld [vmem:[%s4869_s29 + $0xb28] ss:$16 sps:$4 sm:$0xff]  }
 0x1a9   : > { %2855 = vmatpush1.bf16.msra.mxu0 %v4343_v52  ;;  %3113 = vmatpush1.bf16.msra.mxu1 %v4346_v53  ;;  %v4444_v52 = vld [vmem:[%s4869_s29 + $0xb44] ss:$16 sps:$4 sm:$0xff]   ;;  %v4447_v53 = vld [vmem:[%s4869_s29 + $0xb4c] ss:$16 sps:$4 sm:$0xff]  }
 0x1aa   : > { %2856 = vmatprep.subr.bf16.mxu0 %v4351_v54  ;;  %3114 = vmatprep.subr.bf16.mxu1 %v4354_v55  ;;  %v4442_v54 = vld [vmem:[%s4869_s29 + $0xb40] ss:$16 sps:$4 sm:$0xff]   ;;  %v4445_v55 = vld [vmem:[%s4869_s29 + $0xb48] ss:$16 sps:$4 sm:$0xff]  }
 0x1ad   : > { %2857 = vmatpush1.bf16.msra.mxu0 %v4349_v56  ;;  %3115 = vmatpush1.bf16.msra.mxu1 %v4352_v57  ;;  %v4450_v56 = vld [vmem:[%s4869_s29 + $0xb64] ss:$16 sps:$4 sm:$0xff]   ;;  %v4453_v57 = vld [vmem:[%s4869_s29 + $0xb6c] ss:$16 sps:$4 sm:$0xff]  }
 0x1ae   : > { %2858 = vmatprep.subr.bf16.mxu0 %v4357_v58  ;;  %3116 = vmatprep.subr.bf16.mxu1 %v4360_v59  ;;  %v4448_v58 = vld [vmem:[%s4869_s29 + $0xb60] ss:$16 sps:$4 sm:$0xff]   ;;  %v4451_v59 = vld [vmem:[%s4869_s29 + $0xb68] ss:$16 sps:$4 sm:$0xff]  }
 0x1b1   : > { %2859 = vmatpush1.bf16.msra.mxu0 %v4355_v60  ;;  %3117 = vmatpush1.bf16.msra.mxu1 %v4358_v61  ;;  %v4456_v60 = vld [vmem:[%s4869_s29 + $0xb84] ss:$16 sps:$4 sm:$0xff]   ;;  %v4459_v61 = vld [vmem:[%s4869_s29 + $0xb8c] ss:$16 sps:$4 sm:$0xff]  }
 0x1b2   : > { %2860 = vmatprep.subr.bf16.mxu0 %v4363_v62  ;;  %3118 = vmatprep.subr.bf16.mxu1 %v4366_v63  ;;  %v4454_v62 = vld [vmem:[%s4869_s29 + $0xb80] ss:$16 sps:$4 sm:$0xff]   ;;  %v4457_v63 = vld [vmem:[%s4869_s29 + $0xb88] ss:$16 sps:$4 sm:$0xff]  }
 0x1b5   : > { %2861 = vmatpush1.bf16.msra.mxu0 %v4361_v0  ;;  %3119 = vmatpush1.bf16.msra.mxu1 %v4364_v1  ;;  %v4462_v0 = vld [vmem:[%s4869_s29 + $0xba4] ss:$16 sps:$4 sm:$0xff]   ;;  %v4465_v1 = vld [vmem:[%s4869_s29 + $0xbac] ss:$16 sps:$4 sm:$0xff]  }
 0x1b6   : > { %2862 = vmatprep.subr.bf16.mxu0 %v4369_v2  ;;  %3120 = vmatprep.subr.bf16.mxu1 %v4372_v3  ;;  %v4460_v2 = vld [vmem:[%s4869_s29 + $0xba0] ss:$16 sps:$4 sm:$0xff]   ;;  %v4463_v3 = vld [vmem:[%s4869_s29 + $0xba8] ss:$16 sps:$4 sm:$0xff]  }
 0x1b9   : > { %2863 = vmatpush1.bf16.msra.mxu0 %v4367_v4  ;;  %3121 = vmatpush1.bf16.msra.mxu1 %v4370_v5  ;;  %v4468_v4 = vld [vmem:[%s4869_s29 + $0xbc4] ss:$16 sps:$4 sm:$0xff]   ;;  %v4471_v5 = vld [vmem:[%s4869_s29 + $0xbcc] ss:$16 sps:$4 sm:$0xff]  }
 0x1ba   : > { %2864 = vmatprep.subr.bf16.mxu0 %v4375_v6  ;;  %3122 = vmatprep.subr.bf16.mxu1 %v4378_v7  ;;  %v4466_v6 = vld [vmem:[%s4869_s29 + $0xbc0] ss:$16 sps:$4 sm:$0xff]   ;;  %v4469_v7 = vld [vmem:[%s4869_s29 + $0xbc8] ss:$16 sps:$4 sm:$0xff]  }
 0x1bd   : > { %2865 = vmatpush1.bf16.msra.mxu0 %v4373_v8  ;;  %3123 = vmatpush1.bf16.msra.mxu1 %v4376_v9  ;;  %v4474_v8 = vld [vmem:[%s4869_s29 + $0xbe4] ss:$16 sps:$4 sm:$0xff]   ;;  %v4477_v9 = vld [vmem:[%s4869_s29 + $0xbec] ss:$16 sps:$4 sm:$0xff]  }
 0x1be   : > { %2877 = vmatprep.subr.bf16.mxu0 %v4384_v10  ;;  %3135 = vmatprep.subr.bf16.mxu1 %v4387_v11  ;;  %v4472_v10 = vld [vmem:[%s4869_s29 + $0xbe0] ss:$16 sps:$4 sm:$0xff]   ;;  %v4475_v11 = vld [vmem:[%s4869_s29 + $0xbe8] ss:$16 sps:$4 sm:$0xff]  }
 0x1c0   : > { %2867 = vmatmul.mubr.bf16.vlgmr.msra.gmra.mrb[0].mxu0 %v4379_v12  ;;  %3125 = vmatmul.mubr.bf16.vlgmr.msra.gmra.mrb[0].mxu1 %v4379_v12  ;;  %v4478_v12 = vld [vmem:[%s4862_s12 + $0x28] ss:$48 sps:$4 sm:$0xff]  }
 0x1c1   : > { %2878 = vmatpush1.bf16.msra.mxu0 %v4382_v13  ;;  %3136 = vmatpush1.bf16.msra.mxu1 %v4385_v14  ;;  %v278_v13 = vld [vmem:[#allocation2] sm:$0xff]  ;;  %v280_v14 = vld [vmem:[#allocation2 + $0x10] sm:$0xff] }
 0x1c2   : > { %2879 = vmatprep.subr.bf16.mxu0 %v4390_v15  ;;  %3137 = vmatprep.subr.bf16.mxu1 %v4393_v16  ;;  %v279_v15 = vld [vmem:[#allocation2 + $0x8] sm:$0xff]  ;;  %v281_v16 = vld [vmem:[#allocation2 + $0x18] sm:$0xff] }
 0x1c3   : > { %2909 = vmatprep.mubr.bf16.mxu0 %v4480_v17  ;;  %3167 = vmatprep.mubr.bf16.mxu1 %v4480_v17 }
 0x1c5   : > { %2880 = vmatpush1.bf16.msra.mxu0 %v4388_v18  ;;  %3138 = vmatpush1.bf16.msra.mxu1 %v4391_v19  ;;  %v282_v19 = vld [vmem:[#allocation2 + $0x20] sm:$0xff] }
 0x1c6   : > { %2881 = vmatprep.subr.bf16.mxu0 %v4396_v20  ;;  %3139 = vmatprep.subr.bf16.mxu1 %v4399_v21  ;;  %v284_v20 = vld [vmem:[#allocation2 + $0x30] sm:$0xff] }
 0x1c9   : > { %2882 = vmatpush1.bf16.msra.mxu0 %v4394_v22  ;;  %3140 = vmatpush1.bf16.msra.mxu1 %v4397_v23 }
 0x1ca   : > { %2883 = vmatprep.subr.bf16.mxu0 %v4402_v24  ;;  %3141 = vmatprep.subr.bf16.mxu1 %v4405_v25  ;;  %v283_v25 = vld [vmem:[#allocation2 + $0x28] sm:$0xff] }
 0x1cd   : > { %2884 = vmatpush1.bf16.msra.mxu0 %v4400_v26  ;;  %3142 = vmatpush1.bf16.msra.mxu1 %v4403_v27  ;;  %v285_v26 = vld [vmem:[#allocation2 + $0x38] sm:$0xff] }
 0x1ce   : > { %2885 = vmatprep.subr.bf16.mxu0 %v4408_v28  ;;  %3143 = vmatprep.subr.bf16.mxu1 %v4411_v29 }
 0x1d1   : > { %2886 = vmatpush1.bf16.msra.mxu0 %v4406_v30  ;;  %3144 = vmatpush1.bf16.msra.mxu1 %v4409_v31 }
 0x1d2   : > { %2887 = vmatprep.subr.bf16.mxu0 %v4414_v32  ;;  %3145 = vmatprep.subr.bf16.mxu1 %v4417_v33 }
 0x1d5   : > { %2888 = vmatpush1.bf16.msra.mxu0 %v4412_v34  ;;  %3146 = vmatpush1.bf16.msra.mxu1 %v4415_v35 }
 0x1d6   : > { %2889 = vmatprep.subr.bf16.mxu0 %v4420_v36  ;;  %3147 = vmatprep.subr.bf16.mxu1 %v4423_v37 }
 0x1d9   : > { %2890 = vmatpush1.bf16.msra.mxu0 %v4418_v38  ;;  %3148 = vmatpush1.bf16.msra.mxu1 %v4421_v39  ;;  %v3206_v38 = vld [vmem:[#allocation8] sm:$0xff] (!%p3746_p3) }
 0x1da   : > { %2891 = vmatprep.subr.bf16.mxu0 %v4426_v40  ;;  %3149 = vmatprep.subr.bf16.mxu1 %v4429_v41  ;;  %v3207_v41 = vld [vmem:[#allocation8 + $0x8] sm:$0xff] (!%p3746_p3) }
 0x1dd   : > { %2892 = vmatpush1.bf16.msra.mxu0 %v4424_v42  ;;  %3150 = vmatpush1.bf16.msra.mxu1 %v4427_v43  ;;  %v3208_v43 = vld [vmem:[#allocation8 + $0x10] sm:$0xff] (!%p3746_p3) }
 0x1de   : > { %2893 = vmatprep.subr.bf16.mxu0 %v4432_v44  ;;  %3151 = vmatprep.subr.bf16.mxu1 %v4435_v45 }
 0x1e1   : > { %2894 = vmatpush1.bf16.msra.mxu0 %v4430_v46  ;;  %3152 = vmatpush1.bf16.msra.mxu1 %v4433_v47  ;;  %v3209_v47 = vld [vmem:[#allocation8 + $0x18] sm:$0xff] (!%p3746_p3) }
 0x1e2   : > { %2895 = vmatprep.subr.bf16.mxu0 %v4438_v48  ;;  %3153 = vmatprep.subr.bf16.mxu1 %v4441_v49 }
 0x1e5   : > { %2896 = vmatpush1.bf16.msra.mxu0 %v4436_v50  ;;  %3154 = vmatpush1.bf16.msra.mxu1 %v4439_v51  ;;  %v3210_v50 = vld [vmem:[#allocation8 + $0x20] sm:$0xff] (!%p3746_p3) }
 0x1e6   : > { %2897 = vmatprep.subr.bf16.mxu0 %v4444_v52  ;;  %3155 = vmatprep.subr.bf16.mxu1 %v4447_v53  ;;  %v3211_v52 = vld [vmem:[#allocation8 + $0x28] sm:$0xff] (!%p3746_p3) }
 0x1e9   : > { %2898 = vmatpush1.bf16.msra.mxu0 %v4442_v54  ;;  %3156 = vmatpush1.bf16.msra.mxu1 %v4445_v55 }
 0x1ea   : > { %2899 = vmatprep.subr.bf16.mxu0 %v4450_v56  ;;  %3157 = vmatprep.subr.bf16.mxu1 %v4453_v57  ;;  %v3212_v56 = vld [vmem:[#allocation8 + $0x30] sm:$0xff] (!%p3746_p3) }
 0x1ed   : > { %2900 = vmatpush1.bf16.msra.mxu0 %v4448_v58  ;;  %3158 = vmatpush1.bf16.msra.mxu1 %v4451_v59  ;;  %v3213_v59 = vld [vmem:[#allocation8 + $0x38] sm:$0xff] (!%p3746_p3) }
 0x1ee   : > { %2901 = vmatprep.subr.bf16.mxu0 %v4456_v60  ;;  %3159 = vmatprep.subr.bf16.mxu1 %v4459_v61 }
 0x1f1   : > { %2902 = vmatpush1.bf16.msra.mxu0 %v4454_v62  ;;  %3160 = vmatpush1.bf16.msra.mxu1 %v4457_v63 }
 0x1f2   : > { %2903 = vmatprep.subr.bf16.mxu0 %v4462_v0  ;;  %3161 = vmatprep.subr.bf16.mxu1 %v4465_v1 }
 0x1f5   : > { %2904 = vmatpush1.bf16.msra.mxu0 %v4460_v2  ;;  %3162 = vmatpush1.bf16.msra.mxu1 %v4463_v3 }
 0x1f6   : > { %2905 = vmatprep.subr.bf16.mxu0 %v4468_v4  ;;  %3163 = vmatprep.subr.bf16.mxu1 %v4471_v5 }
 0x1f9   : > { %2906 = vmatpush1.bf16.msra.mxu0 %v4466_v6  ;;  %3164 = vmatpush1.bf16.msra.mxu1 %v4469_v7 }
 0x1fa   : > { %2907 = vmatprep.subr.bf16.mxu0 %v4474_v8  ;;  %3165 = vmatprep.subr.bf16.mxu1 %v4477_v9 }
 0x1fd   : > { %2908 = vmatpush1.bf16.msra.mxu0 %v4472_v10  ;;  %3166 = vmatpush1.bf16.msra.mxu1 %v4475_v11 }
 0x200   : > { %2910 = vmatmul.mubr.bf16.vlgmr.msra.gmra.mrb[0].mxu0 %v4478_v12  ;;  %3168 = vmatmul.mubr.bf16.vlgmr.msra.gmra.mrb[0].mxu1 %v4478_v12 }
 0x2d3   : > { %v2911_v17 = vpop.f32.mrb[0].mxu0  ;;  %v3169_v18 = vpop.f32.mrb[0].mxu1  ;;  %3197 = sbr.rel (%p3746_p3) target bundleno = 740 (0x2e4), region = 52 }
 0x2d4   : > { %v3178_v21 = vadd.f32 %v2911_v17, %v278_v13  ;;  %v3180_v22 = vadd.f32 %v3169_v18, %v280_v14  ;;  %v2913_v23 = vpop.f32.mrb[1].mxu0  ;;  %v3171_v24 = vpop.f32.mrb[1].mxu1 }
 0x2d5   : > { %v3179_v27 = vadd.f32 %v2913_v23, %v279_v15  ;;  %v3181_v28 = vadd.f32 %v3171_v24, %v281_v16  ;;  %v2915_v29 = vpop.f32.mrb[2].mxu0  ;;  %v3173_v30 = vpop.f32.mrb[2].mxu1 }
 0x2d6   : > { %3186 = vst [vmem:[#allocation2] sm:$0xff] %v3178_v21  ;;  %3188 = vst [vmem:[#allocation2 + $0x10] sm:$0xff] %v3180_v22  ;;  %v3182_v31 = vadd.f32 %v2915_v29, %v282_v19  ;;  %v3184_v32 = vadd.f32 %v3173_v30, %v284_v20  ;;  %v2917_v33 = vpop.f32.mrb[3].mxu0  ;;  %v3175_v34 = vpop.f32.mrb[3].mxu1 }
 0x2d7   : > { %3187 = vst [vmem:[#allocation2 + $0x8] sm:$0xff] %v3179_v27  ;;  %3189 = vst [vmem:[#allocation2 + $0x18] sm:$0xff] %v3181_v28  ;;  %v3183_v35 = vadd.f32 %v2917_v33, %v283_v25  ;;  %v3185_v36 = vadd.f32 %v3175_v34, %v285_v26 }
 0x2d8   : > { %3190 = vst [vmem:[#allocation2 + $0x20] sm:$0xff] %v3182_v31  ;;  %3192 = vst [vmem:[#allocation2 + $0x30] sm:$0xff] %v3184_v32 }
 0x2d9   : > { %3191 = vst [vmem:[#allocation2 + $0x28] sm:$0xff] %v3183_v35  ;;  %3193 = vst [vmem:[#allocation2 + $0x38] sm:$0xff] %v3185_v36 }
 0x2dd   : > { %v3198_v37 = vld [vmem:[#allocation2] sm:$0xff]  ;;  %v3200_v42 = vld [vmem:[#allocation2 + $0x10] sm:$0xff] }
 0x2de   : > { %v3199_v39 = vld [vmem:[#allocation2 + $0x8] sm:$0xff]  ;;  %v3214_v40 = vadd.f32 %v3206_v38, %v3198_v37  ;;  %v3216_v45 = vadd.f32 %v3208_v43, %v3200_v42  ;;  %v3201_v46 = vld [vmem:[#allocation2 + $0x18] sm:$0xff] }
 0x2df   : > { %v3215_v44 = vadd.f32 %v3207_v41, %v3199_v39  ;;  %v3202_v48 = vld [vmem:[#allocation2 + $0x20] sm:$0xff]  ;;  %v3217_v49 = vadd.f32 %v3209_v47, %v3201_v46  ;;  %v3204_v55 = vld [vmem:[#allocation2 + $0x30] sm:$0xff] }
 0x2e0   : > { %3222 = vst [vmem:[#allocation9] sm:$0xff] %v3214_v40  ;;  %v3203_v51 = vld [vmem:[#allocation2 + $0x28] sm:$0xff]  ;;  %3224 = vst [vmem:[#allocation9 + $0x10] sm:$0xff] %v3216_v45  ;;  %v3218_v53 = vadd.f32 %v3210_v50, %v3202_v48  ;;  %v3205_v57 = vld [vmem:[#allocation2 + $0x38] sm:$0xff]  ;;  %v3220_v58 = vadd.f32 %v3212_v56, %v3204_v55 }
 0x2e1   : > { %3223 = vst [vmem:[#allocation9 + $0x8] sm:$0xff] %v3215_v44  ;;  %v3219_v54 = vadd.f32 %v3211_v52, %v3203_v51  ;;  %3225 = vst [vmem:[#allocation9 + $0x18] sm:$0xff] %v3217_v49  ;;  %v3221_v60 = vadd.f32 %v3213_v59, %v3205_v57 }
 0x2e2   : > { %3226 = vst [vmem:[#allocation9 + $0x20] sm:$0xff] %v3218_v53  ;;  %3228 = vst [vmem:[#allocation9 + $0x30] sm:$0xff] %v3220_v58 }
 0x2e3   : > { %3227 = vst [vmem:[#allocation9 + $0x28] sm:$0xff] %v3219_v54  ;;  %3229 = vst [vmem:[#allocation9 + $0x38] sm:$0xff] %v3221_v60 }
 0x2e4 PF: > { %p3825_p6 = scmp.eq.s32.totalorder %s4722_s18, 1  ;;  %s4670_s15 = smov [#allocation9]  }
 0x2e5   : > { %s3239_s20 = sshll.u32 %s4670_s15, 4  ;;  %s3240_s20 = int_to_ptr.vmem [resolvable:$true] %s3239_s20 }
 0x2e6   : > { %s4569_s21 = scalar_lea.vmem %s3240_s20, 1024  ;;  %p4576_p0 = scmp.lt.s32.totalorder %s3240_s20, %s3240_s20 }
 0x2e7   : > { %p4570_p12 = scmp.ne.s32.totalorder %s3240_s20, %s4569_s21  ;;  %p4577_p4 = scmp.lt.s32.totalorder %s4569_s21, %s4569_s21 }
 0x2e9   : > { %p4571_p1 = pnand %p4570_p12, %p3825_p6  ;;  %p4578_p7 = por %p4577_p4, %p4576_p0 }
 0x2eb   : > { %p4572_p2 = pneg %p4571_p1 }
 0x2ed   : > { %p4579_p9 = pnand %p4578_p7, %p4572_p2 }
 0x2ef   : > { %4582 = shalt.err (!%p4579_p9)
}
 0x2f0   : > { %s4583_s7 = scalar_lea.hbm %s5321_s3, 1024 }
 0x2f1   : > { %p4584_p11 = scmp.ne.s32.totalorder %s5321_s3, %s4583_s7  ;;  %p4589_p10 = scmp.lt.u32.totalorder %s4583_s7, %s5321_s3 }
 0x2f3   : > { %p4585_p5 = pnand %p4584_p11, %p3825_p6 }
 0x2f5   : > { %p4586_p8 = pneg %p4585_p5 }
 0x2f7   : > { %p4591_p13 = pnand %p4589_p10, %p4586_p8 }
 0x2f9   : > { %4594 = shalt.err (!%p4591_p13)
}
 0x2fa   : > { %s4671_s10 = smov 512   ;;  %s4672_s0 = smov 32  }
 0x2fb   : > { %3808 = dma.vmem_to_hbm [thread:$0]  (%p3825_p6), %s3240_s20, 1024, %s5321_s3, [#allocation5], %s4671_s10, %s4671_s10, %s4672_s0  }
 0x2fc   : > { %4632 = dma.done.wait (%p3825_p6), [#allocation5], 1024  }
 0x2fd   : > { %4634 = vsyncadd (%p3825_p6), [#allocation5], 4294966272 }
 0x2fe PF: > { %s20_s17 = sadd.s32 1, %s4657_s17   ;;  %s5337_s12 = smov %s4641_s13 }
 0x2ff   : > { %p17_p3 = scmp.ge.s32.totalorder %s20_s17, 4   ;;  %s5338_s13 = smov %s4645_s14 }
 0x300   : > { %s5339_s14 = smov %s4789_s5  ;;  %s5340_s15 = smov %s4653_s16 }
 0x301   : > { %s5341_s16 = smov %s5343_s26  ;;  %19 = sbr.rel (!%p17_p3) target bundleno = 9 (0x9), region = 96 }
 0x308   :  { %3255 = vsyncpa [#allocation4], 1 }
 0x309   :  { %3257 = vsyncpa [#allocation4 + $0x1], 1 }
 0x30a   :  { %3258 = vsyncpa [#allocation7], 1 }
 0x30b   :  { %3260 = vsyncpa [#allocation7 + $0x1], 1 }
 0x30c   :  { %3261 = vsyncpa [#allocation5], 1 }
 0x30d   :  { %3263 = vsyncpa [#allocation5 + $0x1], 1 }

</bundles_post_ra>
